<compile_context>
chip_gen: v7x
topology: tpu7x:2x2x1
jax: 0.10.0
libtpu: 0.0.40
codegen_flags: <defaults>
</compile_context>

<pallas_src>
import functools
import math

import jax
import jax.numpy as jnp
from jax.experimental import pallas as pl
from jax.experimental.pallas import tpu as pltpu

# ----------------------------- tiny BERT config ------------------------------
VOCAB = 100
TYPE_VOCAB = 2
MAX_POS = 16
HIDDEN = 32
HEADS = 2
HEAD_DIM = HIDDEN // HEADS
INTERMEDIATE = 64
LAYERS = 2
LN_EPS = 1e-12
GELU_C = 0.7978845608028654  # sqrt(2/pi)


# ------------------------------ fused kernel ---------------------------------
def _fused_forward_kernel(
    ids_ref, tt_ref, mask_ref,
    word_emb_ref, pos_emb_ref, type_emb_ref, emb_ln_g_ref, emb_ln_b_ref,
    wqkv_ref, bqkv_ref, wo_ref, bo_ref, ln1_g_ref, ln1_b_ref,
    w1_ref, b1_ref, w2_ref, b2_ref, ln2_g_ref, ln2_b_ref,
    pool_w_ref, pool_b_ref,
    out_ref,
    *, batch, seq,
):
    rows = batch * seq

    def layernorm(x, g, b):
        # f32 statistics; matches torch.nn.LayerNorm (biased var, eps in rsqrt)
        mu = jnp.mean(x, axis=-1, keepdims=True)
        var = jnp.mean((x - mu) * (x - mu), axis=-1, keepdims=True)
        return (x - mu) * jax.lax.rsqrt(var + LN_EPS) * g + b

    def mm(a, w_bf16):
        # activations cast per-use; weights pre-cast bf16 at init; f32 accumulation
        return jnp.dot(a.astype(jnp.bfloat16), w_bf16,
                       preferred_element_type=jnp.float32)

    # ---------------- embeddings (all on-chip) ----------------
    # word: exact gather expressed as a one-hot f32 matmul riding the MXU
    ids = ids_ref[...]                                          # (rows, 1) int32
    onehot = (ids == jax.lax.broadcasted_iota(jnp.int32, (rows, VOCAB), 1)
              ).astype(jnp.float32)                             # (rows, VOCAB)
    emb = jnp.dot(onehot, word_emb_ref[...],
                  preferred_element_type=jnp.float32)           # (rows, H)
    # token-type: TYPE_VOCAB == 2 -> a single select instead of a second matmul
    tt = tt_ref[...]                                            # (rows, 1) int32
    emb = emb + jnp.where(tt == 0, type_emb_ref[0:1, :], type_emb_ref[1:2, :])
    # position: rows are batch-major, so tile the first `seq` table rows
    emb = emb + jnp.tile(pos_emb_ref[0:seq, :], (batch, 1))

    # embedding LayerNorm (no fake residual)
    x = layernorm(emb, emb_ln_g_ref[...], emb_ln_b_ref[...])    # (rows, H)

    # additive key-position mask bias, broadcast over query positions / heads
    bias = (1.0 - mask_ref[...].astype(jnp.float32)) * -10000.0  # (B, 1, S)

    for l in range(LAYERS):                                      # statically unrolled
        # fused Q|K|V projection (1/sqrt(Dh) pre-folded into the Q columns)
        qkv = mm(x, wqkv_ref[l]) + bqkv_ref[l]                   # (rows, 3H) f32

        ctx_heads = []
        for h in range(HEADS):
            c0 = h * HEAD_DIM
            q = qkv[:, c0:c0 + HEAD_DIM].reshape(batch, seq, HEAD_DIM)
            k = qkv[:, HIDDEN + c0:HIDDEN + c0 + HEAD_DIM].reshape(
                batch, seq, HEAD_DIM)
            v = qkv[:, 2 * HIDDEN + c0:2 * HIDDEN + c0 + HEAD_DIM].reshape(
                batch, seq, HEAD_DIM)
            # all batches at once: batched contraction on the feature dim
            scores = jnp.einsum('bqd,bkd->bqk',
                                q.astype(jnp.bfloat16), k.astype(jnp.bfloat16),
                                preferred_element_type=jnp.float32)  # (B, S, S)
            scores = scores + bias
            mx = jnp.max(scores, axis=-1, keepdims=True)
            p = jnp.exp(scores - mx)                             # f32 softmax
            p = p * pl.reciprocal(jnp.sum(p, axis=-1, keepdims=True),
                                  approx=True)                   # EUP reciprocal
            ctx_heads.append(jnp.einsum('bqk,bkd->bqd',
                                        p.astype(jnp.bfloat16),
                                        v.astype(jnp.bfloat16),
                                        preferred_element_type=jnp.float32))
        ctx = jnp.concatenate(ctx_heads, axis=-1).reshape(rows, HIDDEN)

        # attention output projection + residual + LN
        attn_out = mm(ctx, wo_ref[l]) + bo_ref[l]
        x = layernorm(x + attn_out, ln1_g_ref[l], ln1_b_ref[l])

        # FFN with fused tanh-GELU + residual + LN
        h1 = mm(x, w1_ref[l]) + b1_ref[l]                        # (rows, I)
        h1 = 0.5 * h1 * (1.0 + jnp.tanh(GELU_C * (h1 + 0.044715 * h1 * h1 * h1)))
        h2 = mm(h1, w2_ref[l]) + b2_ref[l]                       # (rows, H)
        x = layernorm(x + h2, ln2_g_ref[l], ln2_b_ref[l])

    # ---- CLS rows (sublane select, no concat) + BertPooler tanh(dense(cls)) ----
    cls = x.reshape(batch, seq, HIDDEN)[:, 0, :]                 # (B, H)
    pooled = jnp.tanh(mm(cls, pool_w_ref[...]) + pool_b_ref[...])
    # single combined output slab: [:,0,:] = last_hidden_state[:,0], [:,1,:] = pooler
    out_ref[:, 0, :] = cls.astype(out_ref.dtype)
    out_ref[:, 1, :] = pooled.astype(out_ref.dtype)


# ------------------------- pallas_call plumbing -------------------------------
def _num_tensorcores():
    """Best-effort #TensorCores per chip (2 on v7x); falls back to 1."""
    try:
        info = pltpu.get_tpu_info()
    except Exception:
        return 1
    for name in ("num_tensorcores", "tensorcores_per_chip", "num_cores",
                 "num_cores_per_chip", "core_count"):
        v = getattr(info, name, None)
        if isinstance(v, int) and v >= 1:
            return v
    return 1


def _default_grid_b(batch):
    return max(math.gcd(batch, _num_tensorcores()), 1)


def _fused_encode(ids2, tt2, mask3, params, grid_b):
    b, _, s = mask3.shape
    assert b % grid_b == 0
    bp = b // grid_b
    rows_p = bp * s

    weights = (
        params["word_emb"], params["pos_emb"], params["type_emb"],
        params["emb_ln_g"], params["emb_ln_b"],
        params["wqkv"], params["bqkv"], params["wo"], params["bo"],
        params["ln1_g"], params["ln1_b"],
        params["w1"], params["b1"], params["w2"], params["b2"],
        params["ln2_g"], params["ln2_b"],
        params["pool_w"], params["pool_b"],
    )

    def _rep(shape):                      # weights: same full block every step
        nd = len(shape)
        return pl.BlockSpec(shape, lambda i, _nd=nd: (0,) * _nd)

    in_specs = (
        [pl.BlockSpec((rows_p, 1), lambda i: (i, 0)),      # input ids
         pl.BlockSpec((rows_p, 1), lambda i: (i, 0)),      # token type ids
         pl.BlockSpec((bp, 1, s), lambda i: (i, 0, 0))]    # attention mask
        + [_rep(w.shape) for w in weights]
    )

    return pl.pallas_call(
        functools.partial(_fused_forward_kernel, batch=bp, seq=s),
        grid=(grid_b,),
        in_specs=in_specs,
        out_specs=pl.BlockSpec((bp, 2, HIDDEN), lambda i: (i, 0, 0)),
        out_shape=jax.ShapeDtypeStruct((b, 2, HIDDEN), jnp.float32),
        compiler_params=pltpu.CompilerParams(
            dimension_semantics=("parallel",)),
    )(ids2, tt2, mask3, *weights)


# ---------------------------- parameter construction -------------------------
def init_params(key):
    keys = jax.random.split(key, 4 + LAYERS)

    def dense(k, fan_in, fan_out):
        return 0.02 * jax.random.normal(k, (fan_in, fan_out), jnp.float32)

    scale = 1.0 / math.sqrt(HEAD_DIM)     # folded into Q columns of wqkv

    params = {
        "word_emb": 0.02 * jax.random.normal(keys[0], (VOCAB, HIDDEN), jnp.float32),
        "pos_emb": 0.02 * jax.random.normal(keys[1], (MAX_POS, HIDDEN), jnp.float32),
        "type_emb": 0.02 * jax.random.normal(keys[2], (TYPE_VOCAB, HIDDEN), jnp.float32),
        "emb_ln_g": jnp.ones((1, HIDDEN), jnp.float32),
        "emb_ln_b": jnp.zeros((1, HIDDEN), jnp.float32),
    }
    wqkv, wo, w1, w2 = [], [], [], []
    for l in range(LAYERS):
        lk = jax.random.split(keys[3 + l], 6)
        wq = dense(lk[0], HIDDEN, HIDDEN) * scale     # score scale pre-folded
        wk = dense(lk[1], HIDDEN, HIDDEN)
        wv = dense(lk[2], HIDDEN, HIDDEN)
        wqkv.append(jnp.concatenate([wq, wk, wv], axis=1))   # merged QKV weight
        wo.append(dense(lk[3], HIDDEN, HIDDEN))
        w1.append(dense(lk[4], HIDDEN, INTERMEDIATE))
        w2.append(dense(lk[5], INTERMEDIATE, HIDDEN))
    params.update({
        # matmul weights stored bf16 (halved DMA bytes, no in-kernel weight cast)
        "wqkv": jnp.stack(wqkv).astype(jnp.bfloat16),
        # NOTE: the Q bias would need the same 1/sqrt(Dh) fold; it is zero here.
        "bqkv": jnp.zeros((LAYERS, 1, 3 * HIDDEN), jnp.float32),
        "wo": jnp.stack(wo).astype(jnp.bfloat16),
        "bo": jnp.zeros((LAYERS, 1, HIDDEN), jnp.float32),
        "ln1_g": jnp.ones((LAYERS, 1, HIDDEN), jnp.float32),
        "ln1_b": jnp.zeros((LAYERS, 1, HIDDEN), jnp.float32),
        "w1": jnp.stack(w1).astype(jnp.bfloat16),
        "b1": jnp.zeros((LAYERS, 1, INTERMEDIATE), jnp.float32),
        "w2": jnp.stack(w2).astype(jnp.bfloat16),
        "b2": jnp.zeros((LAYERS, 1, HIDDEN), jnp.float32),
        "ln2_g": jnp.ones((LAYERS, 1, HIDDEN), jnp.float32),
        "ln2_b": jnp.zeros((LAYERS, 1, HIDDEN), jnp.float32),
        "pool_w": dense(keys[3 + LAYERS], HIDDEN, HIDDEN).astype(jnp.bfloat16),
        "pool_b": jnp.zeros((1, HIDDEN), jnp.float32),
    })
    return params


# -------------------------------- forward pass --------------------------------
@functools.partial(jax.jit, static_argnames=("grid_b",))
def _encode_jit(params, input_ids, attention_mask, token_type_ids, grid_b):
    b, s = input_ids.shape
    # wrapper only reshapes/casts ids & mask; gather + bias happen in-kernel
    ids2 = input_ids.reshape(b * s, 1).astype(jnp.int32)
    tt2 = token_type_ids.reshape(b * s, 1).astype(jnp.int32)
    mask3 = attention_mask.reshape(b, 1, s).astype(jnp.int32)
    out = _fused_encode(ids2, tt2, mask3, params, grid_b)     # (B, 2, H)
    return out[:, 0, :], out[:, 1, :]


def encode(params, input_ids, attention_mask, token_type_ids):
    """One fused encoder + pooler pass. Returns (cls_embedding, pooler_output)."""
    grid_b = _default_grid_b(input_ids.shape[0])
    return _encode_jit(params, input_ids, attention_mask, token_type_ids,
                       grid_b=grid_b)


def neural_network_forward(params, input_ids, attention_mask, token_type_ids,
                           output_way="cls"):
    """Equivalent of NeuralNetwork.forward (output_way in {'cls', 'pooler'})."""
    cls, pooled = encode(params, input_ids, attention_mask, token_type_ids)
    if output_way == "cls":
        return cls
    if output_way == "pooler":
        return pooled
    raise ValueError(output_way)


# ------------------------------------ main ------------------------------------
if __name__ == "__main__":
    key = jax.random.PRNGKey(0)
    pkey, ikey = jax.random.split(key)
    params = init_params(pkey)

    B, S = 2, 8
    input_ids = jax.random.randint(ikey, (B, S), 0, VOCAB, dtype=jnp.int32)
    attention_mask = jnp.array([[1, 1, 1, 1, 1, 1, 1, 1],
                                [1, 1, 1, 1, 1, 0, 0, 0]], dtype=jnp.int32)
    token_type_ids = jnp.zeros((B, S), dtype=jnp.int32)

    # single fused encoder pass shared by both output heads
    out_cls, out_pool = encode(params, input_ids, attention_mask, token_type_ids)
    jax.block_until_ready((out_cls, out_pool))

    assert out_cls.shape == (B, HIDDEN) and out_pool.shape == (B, HIDDEN)
    assert bool(jnp.all(jnp.isfinite(out_cls))) and bool(jnp.all(jnp.isfinite(out_pool)))
    print("KERNEL_OK")
</pallas_src>

<mosaic_0001>
module attributes {stable_mosaic.version = 11 : i64} {
  func.func @_fused_forward_kernel(%arg0: i32, %arg1: memref<16x1xi32, #tpu.memory_space<vmem>>, %arg2: memref<16x1xi32, #tpu.memory_space<vmem>>, %arg3: memref<2x1x8xi32, #tpu.memory_space<vmem>>, %arg4: memref<100x32xf32, #tpu.memory_space<vmem>>, %arg5: memref<16x32xf32, #tpu.memory_space<vmem>>, %arg6: memref<2x32xf32, #tpu.memory_space<vmem>>, %arg7: memref<1x32xf32, #tpu.memory_space<vmem>>, %arg8: memref<1x32xf32, #tpu.memory_space<vmem>>, %arg9: memref<2x32x96xbf16, #tpu.memory_space<vmem>>, %arg10: memref<2x1x96xf32, #tpu.memory_space<vmem>>, %arg11: memref<2x32x32xbf16, #tpu.memory_space<vmem>>, %arg12: memref<2x1x32xf32, #tpu.memory_space<vmem>>, %arg13: memref<2x1x32xf32, #tpu.memory_space<vmem>>, %arg14: memref<2x1x32xf32, #tpu.memory_space<vmem>>, %arg15: memref<2x32x64xbf16, #tpu.memory_space<vmem>>, %arg16: memref<2x1x64xf32, #tpu.memory_space<vmem>>, %arg17: memref<2x64x32xbf16, #tpu.memory_space<vmem>>, %arg18: memref<2x1x32xf32, #tpu.memory_space<vmem>>, %arg19: memref<2x1x32xf32, #tpu.memory_space<vmem>>, %arg20: memref<2x1x32xf32, #tpu.memory_space<vmem>>, %arg21: memref<32x32xbf16, #tpu.memory_space<vmem>>, %arg22: memref<1x32xf32, #tpu.memory_space<vmem>>, %arg23: memref<2x2x32xf32, #tpu.memory_space<vmem>>) attributes {dimension_semantics = [#tpu.dimension_semantics<parallel>], iteration_bounds = array<i64: 1>, scalar_prefetch = 0 : i64, scratch_operands = 0 : i64, tpu.core_type = #tpu.core_type<tc>, window_params = [{transform_indices = @transform_0, window_bounds = array<i64: 16, 1>}, {transform_indices = @transform_1, window_bounds = array<i64: 16, 1>}, {transform_indices = @transform_2, window_bounds = array<i64: 2, 1, 8>}, {pipeline_mode = #tpu.pipeline_mode<synchronous>, transform_indices = @transform_3, window_bounds = array<i64: 100, 32>}, {pipeline_mode = #tpu.pipeline_mode<synchronous>, transform_indices = @transform_4, window_bounds = array<i64: 16, 32>}, {pipeline_mode = #tpu.pipeline_mode<synchronous>, transform_indices = @transform_5, window_bounds = array<i64: 2, 32>}, {pipeline_mode = #tpu.pipeline_mode<synchronous>, transform_indices = @transform_6, window_bounds = array<i64: 1, 32>}, {pipeline_mode = #tpu.pipeline_mode<synchronous>, transform_indices = @transform_7, window_bounds = array<i64: 1, 32>}, {pipeline_mode = #tpu.pipeline_mode<synchronous>, transform_indices = @transform_8, window_bounds = array<i64: 2, 32, 96>}, {pipeline_mode = #tpu.pipeline_mode<synchronous>, transform_indices = @transform_9, window_bounds = array<i64: 2, 1, 96>}, {pipeline_mode = #tpu.pipeline_mode<synchronous>, transform_indices = @transform_10, window_bounds = array<i64: 2, 32, 32>}, {pipeline_mode = #tpu.pipeline_mode<synchronous>, transform_indices = @transform_11, window_bounds = array<i64: 2, 1, 32>}, {pipeline_mode = #tpu.pipeline_mode<synchronous>, transform_indices = @transform_12, window_bounds = array<i64: 2, 1, 32>}, {pipeline_mode = #tpu.pipeline_mode<synchronous>, transform_indices = @transform_13, window_bounds = array<i64: 2, 1, 32>}, {pipeline_mode = #tpu.pipeline_mode<synchronous>, transform_indices = @transform_14, window_bounds = array<i64: 2, 32, 64>}, {pipeline_mode = #tpu.pipeline_mode<synchronous>, transform_indices = @transform_15, window_bounds = array<i64: 2, 1, 64>}, {pipeline_mode = #tpu.pipeline_mode<synchronous>, transform_indices = @transform_16, window_bounds = array<i64: 2, 64, 32>}, {pipeline_mode = #tpu.pipeline_mode<synchronous>, transform_indices = @transform_17, window_bounds = array<i64: 2, 1, 32>}, {pipeline_mode = #tpu.pipeline_mode<synchronous>, transform_indices = @transform_18, window_bounds = array<i64: 2, 1, 32>}, {pipeline_mode = #tpu.pipeline_mode<synchronous>, transform_indices = @transform_19, window_bounds = array<i64: 2, 1, 32>}, {pipeline_mode = #tpu.pipeline_mode<synchronous>, transform_indices = @transform_20, window_bounds = array<i64: 32, 32>}, {pipeline_mode = #tpu.pipeline_mode<synchronous>, transform_indices = @transform_21, window_bounds = array<i64: 1, 32>}, {transform_indices = @transform_22, window_bounds = array<i64: 2, 2, 32>}]} {
    %c0 = arith.constant 0 : index
    %c0_0 = arith.constant 0 : index
    %0 = vector.load %arg1[%c0, %c0_0] : memref<16x1xi32, #tpu.memory_space<vmem>>, vector<16x1xi32>
    %1 = tpu.iota {dimensions = array<i32: 1>} : vector<16x100xi32>
    %2 = vector.broadcast %0 : vector<16x1xi32> to vector<16x100xi32>
    %3 = arith.cmpi eq, %2, %1 : vector<16x100xi32>
    %4 = arith.extui %3 : vector<16x100xi1> to vector<16x100xi32>
    %5 = arith.sitofp %4 : vector<16x100xi32> to vector<16x100xf32>
    %c0_1 = arith.constant 0 : index
    %c0_2 = arith.constant 0 : index
    %6 = vector.load %arg4[%c0_1, %c0_2] : memref<100x32xf32, #tpu.memory_space<vmem>>, vector<100x32xf32>
    %cst = arith.constant dense<0.000000e+00> : vector<16x32xf32>
    %7 = tpu.matmul %5, %6, %cst {dimension_numbers = #tpu.dot_dimension_numbers<[1], [0], [0], [1], [0, 0, 1, 1], [], []>} : vector<16x100xf32>, vector<100x32xf32>, vector<16x32xf32> -> vector<16x32xf32>
    %c0_3 = arith.constant 0 : index
    %c0_4 = arith.constant 0 : index
    %8 = vector.load %arg2[%c0_3, %c0_4] : memref<16x1xi32, #tpu.memory_space<vmem>>, vector<16x1xi32>
    %c0_i32 = arith.constant 0 : i32
    %9 = vector.broadcast %c0_i32 : i32 to vector<16x1xi32>
    %10 = arith.cmpi eq, %8, %9 : vector<16x1xi32>
    %c0_5 = arith.constant 0 : index
    %c0_6 = arith.constant 0 : index
    %11 = vector.load %arg6[%c0_5, %c0_6] : memref<2x32xf32, #tpu.memory_space<vmem>>, vector<1x32xf32>
    %c1 = arith.constant 1 : index
    %c0_7 = arith.constant 0 : index
    %12 = vector.load %arg6[%c1, %c0_7] : memref<2x32xf32, #tpu.memory_space<vmem>>, vector<1x32xf32>
    %13 = vector.shape_cast %10 : vector<16x1xi1> to vector<16x1xi1>
    %14 = vector.broadcast %13 : vector<16x1xi1> to vector<16x32xi1>
    %15 = vector.shape_cast %11 : vector<1x32xf32> to vector<1x32xf32>
    %16 = vector.broadcast %15 : vector<1x32xf32> to vector<16x32xf32>
    %17 = vector.shape_cast %12 : vector<1x32xf32> to vector<1x32xf32>
    %18 = vector.broadcast %17 : vector<1x32xf32> to vector<16x32xf32>
    %19 = arith.select %14, %16, %18 : vector<16x32xi1>, vector<16x32xf32>
    %20 = arith.addf %7, %19 : vector<16x32xf32>
    %c0_8 = arith.constant 0 : index
    %c0_9 = arith.constant 0 : index
    %21 = vector.load %arg5[%c0_8, %c0_9] : memref<16x32xf32, #tpu.memory_space<vmem>>, vector<8x32xf32>
    %22 = tpu.concatenate %21, %21 in 0 : vector<8x32xf32>, vector<8x32xf32> -> vector<16x32xf32>
    %23 = arith.addf %20, %22 : vector<16x32xf32>
    %c0_10 = arith.constant 0 : index
    %c0_11 = arith.constant 0 : index
    %24 = vector.load %arg7[%c0_10, %c0_11] : memref<1x32xf32, #tpu.memory_space<vmem>>, vector<1x32xf32>
    %c0_12 = arith.constant 0 : index
    %c0_13 = arith.constant 0 : index
    %25 = vector.load %arg8[%c0_12, %c0_13] : memref<1x32xf32, #tpu.memory_space<vmem>>, vector<1x32xf32>
    %cst_14 = arith.constant dense<0.000000e+00> : vector<16xf32>
    %26 = vector.multi_reduction <add>, %23, %cst_14 [1] : vector<16x32xf32> to vector<16xf32>
    %27 = vector.shape_cast %26 : vector<16xf32> to vector<16x1xf32>
    %cst_15 = arith.constant 3.200000e+01 : f32
    %28 = vector.broadcast %cst_15 : f32 to vector<16x1xf32>
    %29 = arith.divf %27, %28 : vector<16x1xf32>
    %30 = vector.broadcast %29 : vector<16x1xf32> to vector<16x32xf32>
    %31 = arith.subf %23, %30 : vector<16x32xf32>
    %32 = vector.broadcast %29 : vector<16x1xf32> to vector<16x32xf32>
    %33 = arith.subf %23, %32 : vector<16x32xf32>
    %34 = arith.mulf %31, %33 : vector<16x32xf32>
    %cst_16 = arith.constant dense<0.000000e+00> : vector<16xf32>
    %35 = vector.multi_reduction <add>, %34, %cst_16 [1] : vector<16x32xf32> to vector<16xf32>
    %36 = vector.shape_cast %35 : vector<16xf32> to vector<16x1xf32>
    %cst_17 = arith.constant 3.200000e+01 : f32
    %37 = vector.broadcast %cst_17 : f32 to vector<16x1xf32>
    %38 = arith.divf %36, %37 : vector<16x1xf32>
    %39 = vector.broadcast %29 : vector<16x1xf32> to vector<16x32xf32>
    %40 = arith.subf %23, %39 : vector<16x32xf32>
    %cst_18 = arith.constant 9.99999996E-13 : f32
    %41 = vector.broadcast %cst_18 : f32 to vector<16x1xf32>
    %42 = arith.addf %38, %41 : vector<16x1xf32>
    %43 = math.rsqrt %42 : vector<16x1xf32>
    %44 = vector.broadcast %43 : vector<16x1xf32> to vector<16x32xf32>
    %45 = arith.mulf %40, %44 : vector<16x32xf32>
    %46 = vector.broadcast %24 : vector<1x32xf32> to vector<16x32xf32>
    %47 = arith.mulf %45, %46 : vector<16x32xf32>
    %48 = vector.broadcast %25 : vector<1x32xf32> to vector<16x32xf32>
    %49 = arith.addf %47, %48 : vector<16x32xf32>
    %c0_19 = arith.constant 0 : index
    %c0_20 = arith.constant 0 : index
    %c0_21 = arith.constant 0 : index
    %50 = vector.load %arg3[%c0_19, %c0_20, %c0_21] : memref<2x1x8xi32, #tpu.memory_space<vmem>>, vector<2x1x8xi32>
    %51 = arith.sitofp %50 : vector<2x1x8xi32> to vector<2x1x8xf32>
    %cst_22 = arith.constant 1.000000e+00 : f32
    %52 = vector.broadcast %cst_22 : f32 to vector<2x1x8xf32>
    %53 = arith.subf %52, %51 : vector<2x1x8xf32>
    %cst_23 = arith.constant -1.000000e+04 : f32
    %54 = vector.broadcast %cst_23 : f32 to vector<2x1x8xf32>
    %55 = arith.mulf %53, %54 : vector<2x1x8xf32>
    %c0_24 = arith.constant 0 : index
    %c0_25 = arith.constant 0 : index
    %c0_26 = arith.constant 0 : index
    %56 = vector.load %arg9[%c0_24, %c0_25, %c0_26] : memref<2x32x96xbf16, #tpu.memory_space<vmem>>, vector<1x32x96xbf16>
    %57 = vector.shape_cast %56 : vector<1x32x96xbf16> to vector<32x96xbf16>
    %58 = arith.truncf %49 : vector<16x32xf32> to vector<16x32xbf16>
    %cst_27 = arith.constant dense<0.000000e+00> : vector<16x96xf32>
    %59 = tpu.matmul %58, %57, %cst_27 {dimension_numbers = #tpu.dot_dimension_numbers<[1], [0], [0], [1], [0, 0, 1, 1], [], []>} : vector<16x32xbf16>, vector<32x96xbf16>, vector<16x96xf32> -> vector<16x96xf32>
    %c0_28 = arith.constant 0 : index
    %c0_29 = arith.constant 0 : index
    %c0_30 = arith.constant 0 : index
    %60 = vector.load %arg10[%c0_28, %c0_29, %c0_30] : memref<2x1x96xf32, #tpu.memory_space<vmem>>, vector<1x1x96xf32>
    %61 = vector.shape_cast %60 : vector<1x1x96xf32> to vector<1x96xf32>
    %62 = vector.broadcast %61 : vector<1x96xf32> to vector<16x96xf32>
    %63 = arith.addf %59, %62 : vector<16x96xf32>
    %64 = vector.extract_strided_slice %63 {offsets = [0, 0], sizes = [16, 16], strides = [1, 1]} : vector<16x96xf32> to vector<16x16xf32>
    %65 = vector.shape_cast %64 : vector<16x16xf32> to vector<2x8x16xf32>
    %66 = vector.extract_strided_slice %63 {offsets = [0, 32], sizes = [16, 16], strides = [1, 1]} : vector<16x96xf32> to vector<16x16xf32>
    %67 = vector.shape_cast %66 : vector<16x16xf32> to vector<2x8x16xf32>
    %68 = vector.extract_strided_slice %63 {offsets = [0, 64], sizes = [16, 16], strides = [1, 1]} : vector<16x96xf32> to vector<16x16xf32>
    %69 = vector.shape_cast %68 : vector<16x16xf32> to vector<2x8x16xf32>
    %70 = arith.truncf %65 : vector<2x8x16xf32> to vector<2x8x16xbf16>
    %71 = arith.truncf %67 : vector<2x8x16xf32> to vector<2x8x16xbf16>
    "tpu.trace_start"() <{level = 10 : i32, message = "bqd,bkd->bqk"}> : () -> ()
    %cst_31 = arith.constant dense<0.000000e+00> : vector<2x8x8xf32>
    %72 = tpu.matmul %70, %71, %cst_31 {dimension_numbers = #tpu.dot_dimension_numbers<[2], [2], [1], [1], [0, 0, 0, 1, 1, 1], [0], [0]>} : vector<2x8x16xbf16>, vector<2x8x16xbf16>, vector<2x8x8xf32> -> vector<2x8x8xf32>
    "tpu.trace_stop"() : () -> ()
    %73 = vector.broadcast %55 : vector<2x1x8xf32> to vector<2x8x8xf32>
    %74 = arith.addf %72, %73 : vector<2x8x8xf32>
    %cst_32 = arith.constant dense<0xFF800000> : vector<2x8xf32>
    %75 = vector.multi_reduction <maximumf>, %74, %cst_32 [2] : vector<2x8x8xf32> to vector<2x8xf32>
    %76 = vector.shape_cast %75 : vector<2x8xf32> to vector<2x8x1xf32>
    %77 = vector.broadcast %76 : vector<2x8x1xf32> to vector<2x8x8xf32>
    %78 = arith.subf %74, %77 : vector<2x8x8xf32>
    %79 = math.exp %78 : vector<2x8x8xf32>
    %cst_33 = arith.constant dense<0.000000e+00> : vector<2x8xf32>
    %80 = vector.multi_reduction <add>, %79, %cst_33 [2] : vector<2x8x8xf32> to vector<2x8xf32>
    %81 = vector.shape_cast %80 : vector<2x8xf32> to vector<2x8x1xf32>
    %82 = tpu.reciprocal %81 {approx = true} : vector<2x8x1xf32> -> vector<2x8x1xf32>
    %83 = vector.broadcast %82 : vector<2x8x1xf32> to vector<2x8x8xf32>
    %84 = arith.mulf %79, %83 : vector<2x8x8xf32>
    %85 = arith.truncf %84 : vector<2x8x8xf32> to vector<2x8x8xbf16>
    %86 = arith.truncf %69 : vector<2x8x16xf32> to vector<2x8x16xbf16>
    "tpu.trace_start"() <{level = 10 : i32, message = "bqk,bkd->bqd"}> : () -> ()
    %cst_34 = arith.constant dense<0.000000e+00> : vector<2x8x16xf32>
    %87 = tpu.matmul %85, %86, %cst_34 {dimension_numbers = #tpu.dot_dimension_numbers<[2], [1], [1], [2], [0, 0, 0, 1, 1, 2], [0], [0]>} : vector<2x8x8xbf16>, vector<2x8x16xbf16>, vector<2x8x16xf32> -> vector<2x8x16xf32>
    "tpu.trace_stop"() : () -> ()
    %88 = vector.extract_strided_slice %63 {offsets = [0, 16], sizes = [16, 16], strides = [1, 1]} : vector<16x96xf32> to vector<16x16xf32>
    %89 = vector.shape_cast %88 : vector<16x16xf32> to vector<2x8x16xf32>
    %90 = vector.extract_strided_slice %63 {offsets = [0, 48], sizes = [16, 16], strides = [1, 1]} : vector<16x96xf32> to vector<16x16xf32>
    %91 = vector.shape_cast %90 : vector<16x16xf32> to vector<2x8x16xf32>
    %92 = vector.extract_strided_slice %63 {offsets = [0, 80], sizes = [16, 16], strides = [1, 1]} : vector<16x96xf32> to vector<16x16xf32>
    %93 = vector.shape_cast %92 : vector<16x16xf32> to vector<2x8x16xf32>
    %94 = arith.truncf %89 : vector<2x8x16xf32> to vector<2x8x16xbf16>
    %95 = arith.truncf %91 : vector<2x8x16xf32> to vector<2x8x16xbf16>
    "tpu.trace_start"() <{level = 10 : i32, message = "bqd,bkd->bqk"}> : () -> ()
    %cst_35 = arith.constant dense<0.000000e+00> : vector<2x8x8xf32>
    %96 = tpu.matmul %94, %95, %cst_35 {dimension_numbers = #tpu.dot_dimension_numbers<[2], [2], [1], [1], [0, 0, 0, 1, 1, 1], [0], [0]>} : vector<2x8x16xbf16>, vector<2x8x16xbf16>, vector<2x8x8xf32> -> vector<2x8x8xf32>
    "tpu.trace_stop"() : () -> ()
    %97 = vector.broadcast %55 : vector<2x1x8xf32> to vector<2x8x8xf32>
    %98 = arith.addf %96, %97 : vector<2x8x8xf32>
    %cst_36 = arith.constant dense<0xFF800000> : vector<2x8xf32>
    %99 = vector.multi_reduction <maximumf>, %98, %cst_36 [2] : vector<2x8x8xf32> to vector<2x8xf32>
    %100 = vector.shape_cast %99 : vector<2x8xf32> to vector<2x8x1xf32>
    %101 = vector.broadcast %100 : vector<2x8x1xf32> to vector<2x8x8xf32>
    %102 = arith.subf %98, %101 : vector<2x8x8xf32>
    %103 = math.exp %102 : vector<2x8x8xf32>
    %cst_37 = arith.constant dense<0.000000e+00> : vector<2x8xf32>
    %104 = vector.multi_reduction <add>, %103, %cst_37 [2] : vector<2x8x8xf32> to vector<2x8xf32>
    %105 = vector.shape_cast %104 : vector<2x8xf32> to vector<2x8x1xf32>
    %106 = tpu.reciprocal %105 {approx = true} : vector<2x8x1xf32> -> vector<2x8x1xf32>
    %107 = vector.broadcast %106 : vector<2x8x1xf32> to vector<2x8x8xf32>
    %108 = arith.mulf %103, %107 : vector<2x8x8xf32>
    %109 = arith.truncf %108 : vector<2x8x8xf32> to vector<2x8x8xbf16>
    %110 = arith.truncf %93 : vector<2x8x16xf32> to vector<2x8x16xbf16>
    "tpu.trace_start"() <{level = 10 : i32, message = "bqk,bkd->bqd"}> : () -> ()
    %cst_38 = arith.constant dense<0.000000e+00> : vector<2x8x16xf32>
    %111 = tpu.matmul %109, %110, %cst_38 {dimension_numbers = #tpu.dot_dimension_numbers<[2], [1], [1], [2], [0, 0, 0, 1, 1, 2], [0], [0]>} : vector<2x8x8xbf16>, vector<2x8x16xbf16>, vector<2x8x16xf32> -> vector<2x8x16xf32>
    "tpu.trace_stop"() : () -> ()
    %112 = tpu.concatenate %87, %111 in 2 : vector<2x8x16xf32>, vector<2x8x16xf32> -> vector<2x8x32xf32>
    %113 = vector.shape_cast %112 : vector<2x8x32xf32> to vector<16x32xf32>
    %c0_39 = arith.constant 0 : index
    %c0_40 = arith.constant 0 : index
    %c0_41 = arith.constant 0 : index
    %114 = vector.load %arg11[%c0_39, %c0_40, %c0_41] : memref<2x32x32xbf16, #tpu.memory_space<vmem>>, vector<1x32x32xbf16>
    %115 = vector.shape_cast %114 : vector<1x32x32xbf16> to vector<32x32xbf16>
    %116 = arith.truncf %113 : vector<16x32xf32> to vector<16x32xbf16>
    %cst_42 = arith.constant dense<0.000000e+00> : vector<16x32xf32>
    %117 = tpu.matmul %116, %115, %cst_42 {dimension_numbers = #tpu.dot_dimension_numbers<[1], [0], [0], [1], [0, 0, 1, 1], [], []>} : vector<16x32xbf16>, vector<32x32xbf16>, vector<16x32xf32> -> vector<16x32xf32>
    %c0_43 = arith.constant 0 : index
    %c0_44 = arith.constant 0 : index
    %c0_45 = arith.constant 0 : index
    %118 = vector.load %arg12[%c0_43, %c0_44, %c0_45] : memref<2x1x32xf32, #tpu.memory_space<vmem>>, vector<1x1x32xf32>
    %119 = vector.shape_cast %118 : vector<1x1x32xf32> to vector<1x32xf32>
    %120 = vector.broadcast %119 : vector<1x32xf32> to vector<16x32xf32>
    %121 = arith.addf %117, %120 : vector<16x32xf32>
    %122 = arith.addf %49, %121 : vector<16x32xf32>
    %c0_46 = arith.constant 0 : index
    %c0_47 = arith.constant 0 : index
    %c0_48 = arith.constant 0 : index
    %123 = vector.load %arg13[%c0_46, %c0_47, %c0_48] : memref<2x1x32xf32, #tpu.memory_space<vmem>>, vector<1x1x32xf32>
    %124 = vector.shape_cast %123 : vector<1x1x32xf32> to vector<1x32xf32>
    %c0_49 = arith.constant 0 : index
    %c0_50 = arith.constant 0 : index
    %c0_51 = arith.constant 0 : index
    %125 = vector.load %arg14[%c0_49, %c0_50, %c0_51] : memref<2x1x32xf32, #tpu.memory_space<vmem>>, vector<1x1x32xf32>
    %126 = vector.shape_cast %125 : vector<1x1x32xf32> to vector<1x32xf32>
    %cst_52 = arith.constant dense<0.000000e+00> : vector<16xf32>
    %127 = vector.multi_reduction <add>, %122, %cst_52 [1] : vector<16x32xf32> to vector<16xf32>
    %128 = vector.shape_cast %127 : vector<16xf32> to vector<16x1xf32>
    %cst_53 = arith.constant 3.200000e+01 : f32
    %129 = vector.broadcast %cst_53 : f32 to vector<16x1xf32>
    %130 = arith.divf %128, %129 : vector<16x1xf32>
    %131 = vector.broadcast %130 : vector<16x1xf32> to vector<16x32xf32>
    %132 = arith.subf %122, %131 : vector<16x32xf32>
    %133 = vector.broadcast %130 : vector<16x1xf32> to vector<16x32xf32>
    %134 = arith.subf %122, %133 : vector<16x32xf32>
    %135 = arith.mulf %132, %134 : vector<16x32xf32>
    %cst_54 = arith.constant dense<0.000000e+00> : vector<16xf32>
    %136 = vector.multi_reduction <add>, %135, %cst_54 [1] : vector<16x32xf32> to vector<16xf32>
    %137 = vector.shape_cast %136 : vector<16xf32> to vector<16x1xf32>
    %cst_55 = arith.constant 3.200000e+01 : f32
    %138 = vector.broadcast %cst_55 : f32 to vector<16x1xf32>
    %139 = arith.divf %137, %138 : vector<16x1xf32>
    %140 = vector.broadcast %130 : vector<16x1xf32> to vector<16x32xf32>
    %141 = arith.subf %122, %140 : vector<16x32xf32>
    %cst_56 = arith.constant 9.99999996E-13 : f32
    %142 = vector.broadcast %cst_56 : f32 to vector<16x1xf32>
    %143 = arith.addf %139, %142 : vector<16x1xf32>
    %144 = math.rsqrt %143 : vector<16x1xf32>
    %145 = vector.broadcast %144 : vector<16x1xf32> to vector<16x32xf32>
    %146 = arith.mulf %141, %145 : vector<16x32xf32>
    %147 = vector.broadcast %124 : vector<1x32xf32> to vector<16x32xf32>
    %148 = arith.mulf %146, %147 : vector<16x32xf32>
    %149 = vector.broadcast %126 : vector<1x32xf32> to vector<16x32xf32>
    %150 = arith.addf %148, %149 : vector<16x32xf32>
    %c0_57 = arith.constant 0 : index
    %c0_58 = arith.constant 0 : index
    %c0_59 = arith.constant 0 : index
    %151 = vector.load %arg15[%c0_57, %c0_58, %c0_59] : memref<2x32x64xbf16, #tpu.memory_space<vmem>>, vector<1x32x64xbf16>
    %152 = vector.shape_cast %151 : vector<1x32x64xbf16> to vector<32x64xbf16>
    %153 = arith.truncf %150 : vector<16x32xf32> to vector<16x32xbf16>
    %cst_60 = arith.constant dense<0.000000e+00> : vector<16x64xf32>
    %154 = tpu.matmul %153, %152, %cst_60 {dimension_numbers = #tpu.dot_dimension_numbers<[1], [0], [0], [1], [0, 0, 1, 1], [], []>} : vector<16x32xbf16>, vector<32x64xbf16>, vector<16x64xf32> -> vector<16x64xf32>
    %c0_61 = arith.constant 0 : index
    %c0_62 = arith.constant 0 : index
    %c0_63 = arith.constant 0 : index
    %155 = vector.load %arg16[%c0_61, %c0_62, %c0_63] : memref<2x1x64xf32, #tpu.memory_space<vmem>>, vector<1x1x64xf32>
    %156 = vector.shape_cast %155 : vector<1x1x64xf32> to vector<1x64xf32>
    %157 = vector.broadcast %156 : vector<1x64xf32> to vector<16x64xf32>
    %158 = arith.addf %154, %157 : vector<16x64xf32>
    %cst_64 = arith.constant 5.000000e-01 : f32
    %159 = vector.broadcast %cst_64 : f32 to vector<16x64xf32>
    %160 = arith.mulf %159, %158 : vector<16x64xf32>
    %cst_65 = arith.constant 4.471500e-02 : f32
    %161 = vector.broadcast %cst_65 : f32 to vector<16x64xf32>
    %162 = arith.mulf %161, %158 : vector<16x64xf32>
    %163 = arith.mulf %162, %158 : vector<16x64xf32>
    %164 = arith.mulf %163, %158 : vector<16x64xf32>
    %165 = arith.addf %158, %164 : vector<16x64xf32>
    %cst_66 = arith.constant 0.797884583 : f32
    %166 = vector.broadcast %cst_66 : f32 to vector<16x64xf32>
    %167 = arith.mulf %166, %165 : vector<16x64xf32>
    %168 = math.tanh %167 : vector<16x64xf32>
    %cst_67 = arith.constant 1.000000e+00 : f32
    %169 = vector.broadcast %cst_67 : f32 to vector<16x64xf32>
    %170 = arith.addf %169, %168 : vector<16x64xf32>
    %171 = arith.mulf %160, %170 : vector<16x64xf32>
    %c0_68 = arith.constant 0 : index
    %c0_69 = arith.constant 0 : index
    %c0_70 = arith.constant 0 : index
    %172 = vector.load %arg17[%c0_68, %c0_69, %c0_70] : memref<2x64x32xbf16, #tpu.memory_space<vmem>>, vector<1x64x32xbf16>
    %173 = vector.shape_cast %172 : vector<1x64x32xbf16> to vector<64x32xbf16>
    %174 = arith.truncf %171 : vector<16x64xf32> to vector<16x64xbf16>
    %cst_71 = arith.constant dense<0.000000e+00> : vector<16x32xf32>
    %175 = tpu.matmul %174, %173, %cst_71 {dimension_numbers = #tpu.dot_dimension_numbers<[1], [0], [0], [1], [0, 0, 1, 1], [], []>} : vector<16x64xbf16>, vector<64x32xbf16>, vector<16x32xf32> -> vector<16x32xf32>
    %c0_72 = arith.constant 0 : index
    %c0_73 = arith.constant 0 : index
    %c0_74 = arith.constant 0 : index
    %176 = vector.load %arg18[%c0_72, %c0_73, %c0_74] : memref<2x1x32xf32, #tpu.memory_space<vmem>>, vector<1x1x32xf32>
    %177 = vector.shape_cast %176 : vector<1x1x32xf32> to vector<1x32xf32>
    %178 = vector.broadcast %177 : vector<1x32xf32> to vector<16x32xf32>
    %179 = arith.addf %175, %178 : vector<16x32xf32>
    %180 = arith.addf %150, %179 : vector<16x32xf32>
    %c0_75 = arith.constant 0 : index
    %c0_76 = arith.constant 0 : index
    %c0_77 = arith.constant 0 : index
    %181 = vector.load %arg19[%c0_75, %c0_76, %c0_77] : memref<2x1x32xf32, #tpu.memory_space<vmem>>, vector<1x1x32xf32>
    %182 = vector.shape_cast %181 : vector<1x1x32xf32> to vector<1x32xf32>
    %c0_78 = arith.constant 0 : index
    %c0_79 = arith.constant 0 : index
    %c0_80 = arith.constant 0 : index
    %183 = vector.load %arg20[%c0_78, %c0_79, %c0_80] : memref<2x1x32xf32, #tpu.memory_space<vmem>>, vector<1x1x32xf32>
    %184 = vector.shape_cast %183 : vector<1x1x32xf32> to vector<1x32xf32>
    %cst_81 = arith.constant dense<0.000000e+00> : vector<16xf32>
    %185 = vector.multi_reduction <add>, %180, %cst_81 [1] : vector<16x32xf32> to vector<16xf32>
    %186 = vector.shape_cast %185 : vector<16xf32> to vector<16x1xf32>
    %cst_82 = arith.constant 3.200000e+01 : f32
    %187 = vector.broadcast %cst_82 : f32 to vector<16x1xf32>
    %188 = arith.divf %186, %187 : vector<16x1xf32>
    %189 = vector.broadcast %188 : vector<16x1xf32> to vector<16x32xf32>
    %190 = arith.subf %180, %189 : vector<16x32xf32>
    %191 = vector.broadcast %188 : vector<16x1xf32> to vector<16x32xf32>
    %192 = arith.subf %180, %191 : vector<16x32xf32>
    %193 = arith.mulf %190, %192 : vector<16x32xf32>
    %cst_83 = arith.constant dense<0.000000e+00> : vector<16xf32>
    %194 = vector.multi_reduction <add>, %193, %cst_83 [1] : vector<16x32xf32> to vector<16xf32>
    %195 = vector.shape_cast %194 : vector<16xf32> to vector<16x1xf32>
    %cst_84 = arith.constant 3.200000e+01 : f32
    %196 = vector.broadcast %cst_84 : f32 to vector<16x1xf32>
    %197 = arith.divf %195, %196 : vector<16x1xf32>
    %198 = vector.broadcast %188 : vector<16x1xf32> to vector<16x32xf32>
    %199 = arith.subf %180, %198 : vector<16x32xf32>
    %cst_85 = arith.constant 9.99999996E-13 : f32
    %200 = vector.broadcast %cst_85 : f32 to vector<16x1xf32>
    %201 = arith.addf %197, %200 : vector<16x1xf32>
    %202 = math.rsqrt %201 : vector<16x1xf32>
    %203 = vector.broadcast %202 : vector<16x1xf32> to vector<16x32xf32>
    %204 = arith.mulf %199, %203 : vector<16x32xf32>
    %205 = vector.broadcast %182 : vector<1x32xf32> to vector<16x32xf32>
    %206 = arith.mulf %204, %205 : vector<16x32xf32>
    %207 = vector.broadcast %184 : vector<1x32xf32> to vector<16x32xf32>
    %208 = arith.addf %206, %207 : vector<16x32xf32>
    %c1_86 = arith.constant 1 : index
    %c0_87 = arith.constant 0 : index
    %c0_88 = arith.constant 0 : index
    %209 = vector.load %arg9[%c1_86, %c0_87, %c0_88] : memref<2x32x96xbf16, #tpu.memory_space<vmem>>, vector<1x32x96xbf16>
    %210 = vector.shape_cast %209 : vector<1x32x96xbf16> to vector<32x96xbf16>
    %211 = arith.truncf %208 : vector<16x32xf32> to vector<16x32xbf16>
    %cst_89 = arith.constant dense<0.000000e+00> : vector<16x96xf32>
    %212 = tpu.matmul %211, %210, %cst_89 {dimension_numbers = #tpu.dot_dimension_numbers<[1], [0], [0], [1], [0, 0, 1, 1], [], []>} : vector<16x32xbf16>, vector<32x96xbf16>, vector<16x96xf32> -> vector<16x96xf32>
    %c1_90 = arith.constant 1 : index
    %c0_91 = arith.constant 0 : index
    %c0_92 = arith.constant 0 : index
    %213 = vector.load %arg10[%c1_90, %c0_91, %c0_92] : memref<2x1x96xf32, #tpu.memory_space<vmem>>, vector<1x1x96xf32>
    %214 = vector.shape_cast %213 : vector<1x1x96xf32> to vector<1x96xf32>
    %215 = vector.broadcast %214 : vector<1x96xf32> to vector<16x96xf32>
    %216 = arith.addf %212, %215 : vector<16x96xf32>
    %217 = vector.extract_strided_slice %216 {offsets = [0, 0], sizes = [16, 16], strides = [1, 1]} : vector<16x96xf32> to vector<16x16xf32>
    %218 = vector.shape_cast %217 : vector<16x16xf32> to vector<2x8x16xf32>
    %219 = vector.extract_strided_slice %216 {offsets = [0, 32], sizes = [16, 16], strides = [1, 1]} : vector<16x96xf32> to vector<16x16xf32>
    %220 = vector.shape_cast %219 : vector<16x16xf32> to vector<2x8x16xf32>
    %221 = vector.extract_strided_slice %216 {offsets = [0, 64], sizes = [16, 16], strides = [1, 1]} : vector<16x96xf32> to vector<16x16xf32>
    %222 = vector.shape_cast %221 : vector<16x16xf32> to vector<2x8x16xf32>
    %223 = arith.truncf %218 : vector<2x8x16xf32> to vector<2x8x16xbf16>
    %224 = arith.truncf %220 : vector<2x8x16xf32> to vector<2x8x16xbf16>
    "tpu.trace_start"() <{level = 10 : i32, message = "bqd,bkd->bqk"}> : () -> ()
    %cst_93 = arith.constant dense<0.000000e+00> : vector<2x8x8xf32>
    %225 = tpu.matmul %223, %224, %cst_93 {dimension_numbers = #tpu.dot_dimension_numbers<[2], [2], [1], [1], [0, 0, 0, 1, 1, 1], [0], [0]>} : vector<2x8x16xbf16>, vector<2x8x16xbf16>, vector<2x8x8xf32> -> vector<2x8x8xf32>
    "tpu.trace_stop"() : () -> ()
    %226 = vector.broadcast %55 : vector<2x1x8xf32> to vector<2x8x8xf32>
    %227 = arith.addf %225, %226 : vector<2x8x8xf32>
    %cst_94 = arith.constant dense<0xFF800000> : vector<2x8xf32>
    %228 = vector.multi_reduction <maximumf>, %227, %cst_94 [2] : vector<2x8x8xf32> to vector<2x8xf32>
    %229 = vector.shape_cast %228 : vector<2x8xf32> to vector<2x8x1xf32>
    %230 = vector.broadcast %229 : vector<2x8x1xf32> to vector<2x8x8xf32>
    %231 = arith.subf %227, %230 : vector<2x8x8xf32>
    %232 = math.exp %231 : vector<2x8x8xf32>
    %cst_95 = arith.constant dense<0.000000e+00> : vector<2x8xf32>
    %233 = vector.multi_reduction <add>, %232, %cst_95 [2] : vector<2x8x8xf32> to vector<2x8xf32>
    %234 = vector.shape_cast %233 : vector<2x8xf32> to vector<2x8x1xf32>
    %235 = tpu.reciprocal %234 {approx = true} : vector<2x8x1xf32> -> vector<2x8x1xf32>
    %236 = vector.broadcast %235 : vector<2x8x1xf32> to vector<2x8x8xf32>
    %237 = arith.mulf %232, %236 : vector<2x8x8xf32>
    %238 = arith.truncf %237 : vector<2x8x8xf32> to vector<2x8x8xbf16>
    %239 = arith.truncf %222 : vector<2x8x16xf32> to vector<2x8x16xbf16>
    "tpu.trace_start"() <{level = 10 : i32, message = "bqk,bkd->bqd"}> : () -> ()
    %cst_96 = arith.constant dense<0.000000e+00> : vector<2x8x16xf32>
    %240 = tpu.matmul %238, %239, %cst_96 {dimension_numbers = #tpu.dot_dimension_numbers<[2], [1], [1], [2], [0, 0, 0, 1, 1, 2], [0], [0]>} : vector<2x8x8xbf16>, vector<2x8x16xbf16>, vector<2x8x16xf32> -> vector<2x8x16xf32>
    "tpu.trace_stop"() : () -> ()
    %241 = vector.extract_strided_slice %216 {offsets = [0, 16], sizes = [16, 16], strides = [1, 1]} : vector<16x96xf32> to vector<16x16xf32>
    %242 = vector.shape_cast %241 : vector<16x16xf32> to vector<2x8x16xf32>
    %243 = vector.extract_strided_slice %216 {offsets = [0, 48], sizes = [16, 16], strides = [1, 1]} : vector<16x96xf32> to vector<16x16xf32>
    %244 = vector.shape_cast %243 : vector<16x16xf32> to vector<2x8x16xf32>
    %245 = vector.extract_strided_slice %216 {offsets = [0, 80], sizes = [16, 16], strides = [1, 1]} : vector<16x96xf32> to vector<16x16xf32>
    %246 = vector.shape_cast %245 : vector<16x16xf32> to vector<2x8x16xf32>
    %247 = arith.truncf %242 : vector<2x8x16xf32> to vector<2x8x16xbf16>
    %248 = arith.truncf %244 : vector<2x8x16xf32> to vector<2x8x16xbf16>
    "tpu.trace_start"() <{level = 10 : i32, message = "bqd,bkd->bqk"}> : () -> ()
    %cst_97 = arith.constant dense<0.000000e+00> : vector<2x8x8xf32>
    %249 = tpu.matmul %247, %248, %cst_97 {dimension_numbers = #tpu.dot_dimension_numbers<[2], [2], [1], [1], [0, 0, 0, 1, 1, 1], [0], [0]>} : vector<2x8x16xbf16>, vector<2x8x16xbf16>, vector<2x8x8xf32> -> vector<2x8x8xf32>
    "tpu.trace_stop"() : () -> ()
    %250 = vector.broadcast %55 : vector<2x1x8xf32> to vector<2x8x8xf32>
    %251 = arith.addf %249, %250 : vector<2x8x8xf32>
    %cst_98 = arith.constant dense<0xFF800000> : vector<2x8xf32>
    %252 = vector.multi_reduction <maximumf>, %251, %cst_98 [2] : vector<2x8x8xf32> to vector<2x8xf32>
    %253 = vector.shape_cast %252 : vector<2x8xf32> to vector<2x8x1xf32>
    %254 = vector.broadcast %253 : vector<2x8x1xf32> to vector<2x8x8xf32>
    %255 = arith.subf %251, %254 : vector<2x8x8xf32>
    %256 = math.exp %255 : vector<2x8x8xf32>
    %cst_99 = arith.constant dense<0.000000e+00> : vector<2x8xf32>
    %257 = vector.multi_reduction <add>, %256, %cst_99 [2] : vector<2x8x8xf32> to vector<2x8xf32>
    %258 = vector.shape_cast %257 : vector<2x8xf32> to vector<2x8x1xf32>
    %259 = tpu.reciprocal %258 {approx = true} : vector<2x8x1xf32> -> vector<2x8x1xf32>
    %260 = vector.broadcast %259 : vector<2x8x1xf32> to vector<2x8x8xf32>
    %261 = arith.mulf %256, %260 : vector<2x8x8xf32>
    %262 = arith.truncf %261 : vector<2x8x8xf32> to vector<2x8x8xbf16>
    %263 = arith.truncf %246 : vector<2x8x16xf32> to vector<2x8x16xbf16>
    "tpu.trace_start"() <{level = 10 : i32, message = "bqk,bkd->bqd"}> : () -> ()
    %cst_100 = arith.constant dense<0.000000e+00> : vector<2x8x16xf32>
    %264 = tpu.matmul %262, %263, %cst_100 {dimension_numbers = #tpu.dot_dimension_numbers<[2], [1], [1], [2], [0, 0, 0, 1, 1, 2], [0], [0]>} : vector<2x8x8xbf16>, vector<2x8x16xbf16>, vector<2x8x16xf32> -> vector<2x8x16xf32>
    "tpu.trace_stop"() : () -> ()
    %265 = tpu.concatenate %240, %264 in 2 : vector<2x8x16xf32>, vector<2x8x16xf32> -> vector<2x8x32xf32>
    %266 = vector.shape_cast %265 : vector<2x8x32xf32> to vector<16x32xf32>
    %c1_101 = arith.constant 1 : index
    %c0_102 = arith.constant 0 : index
    %c0_103 = arith.constant 0 : index
    %267 = vector.load %arg11[%c1_101, %c0_102, %c0_103] : memref<2x32x32xbf16, #tpu.memory_space<vmem>>, vector<1x32x32xbf16>
    %268 = vector.shape_cast %267 : vector<1x32x32xbf16> to vector<32x32xbf16>
    %269 = arith.truncf %266 : vector<16x32xf32> to vector<16x32xbf16>
    %cst_104 = arith.constant dense<0.000000e+00> : vector<16x32xf32>
    %270 = tpu.matmul %269, %268, %cst_104 {dimension_numbers = #tpu.dot_dimension_numbers<[1], [0], [0], [1], [0, 0, 1, 1], [], []>} : vector<16x32xbf16>, vector<32x32xbf16>, vector<16x32xf32> -> vector<16x32xf32>
    %c1_105 = arith.constant 1 : index
    %c0_106 = arith.constant 0 : index
    %c0_107 = arith.constant 0 : index
    %271 = vector.load %arg12[%c1_105, %c0_106, %c0_107] : memref<2x1x32xf32, #tpu.memory_space<vmem>>, vector<1x1x32xf32>
    %272 = vector.shape_cast %271 : vector<1x1x32xf32> to vector<1x32xf32>
    %273 = vector.broadcast %272 : vector<1x32xf32> to vector<16x32xf32>
    %274 = arith.addf %270, %273 : vector<16x32xf32>
    %275 = arith.addf %208, %274 : vector<16x32xf32>
    %c1_108 = arith.constant 1 : index
    %c0_109 = arith.constant 0 : index
    %c0_110 = arith.constant 0 : index
    %276 = vector.load %arg13[%c1_108, %c0_109, %c0_110] : memref<2x1x32xf32, #tpu.memory_space<vmem>>, vector<1x1x32xf32>
    %277 = vector.shape_cast %276 : vector<1x1x32xf32> to vector<1x32xf32>
    %c1_111 = arith.constant 1 : index
    %c0_112 = arith.constant 0 : index
    %c0_113 = arith.constant 0 : index
    %278 = vector.load %arg14[%c1_111, %c0_112, %c0_113] : memref<2x1x32xf32, #tpu.memory_space<vmem>>, vector<1x1x32xf32>
    %279 = vector.shape_cast %278 : vector<1x1x32xf32> to vector<1x32xf32>
    %cst_114 = arith.constant dense<0.000000e+00> : vector<16xf32>
    %280 = vector.multi_reduction <add>, %275, %cst_114 [1] : vector<16x32xf32> to vector<16xf32>
    %281 = vector.shape_cast %280 : vector<16xf32> to vector<16x1xf32>
    %cst_115 = arith.constant 3.200000e+01 : f32
    %282 = vector.broadcast %cst_115 : f32 to vector<16x1xf32>
    %283 = arith.divf %281, %282 : vector<16x1xf32>
    %284 = vector.broadcast %283 : vector<16x1xf32> to vector<16x32xf32>
    %285 = arith.subf %275, %284 : vector<16x32xf32>
    %286 = vector.broadcast %283 : vector<16x1xf32> to vector<16x32xf32>
    %287 = arith.subf %275, %286 : vector<16x32xf32>
    %288 = arith.mulf %285, %287 : vector<16x32xf32>
    %cst_116 = arith.constant dense<0.000000e+00> : vector<16xf32>
    %289 = vector.multi_reduction <add>, %288, %cst_116 [1] : vector<16x32xf32> to vector<16xf32>
    %290 = vector.shape_cast %289 : vector<16xf32> to vector<16x1xf32>
    %cst_117 = arith.constant 3.200000e+01 : f32
    %291 = vector.broadcast %cst_117 : f32 to vector<16x1xf32>
    %292 = arith.divf %290, %291 : vector<16x1xf32>
    %293 = vector.broadcast %283 : vector<16x1xf32> to vector<16x32xf32>
    %294 = arith.subf %275, %293 : vector<16x32xf32>
    %cst_118 = arith.constant 9.99999996E-13 : f32
    %295 = vector.broadcast %cst_118 : f32 to vector<16x1xf32>
    %296 = arith.addf %292, %295 : vector<16x1xf32>
    %297 = math.rsqrt %296 : vector<16x1xf32>
    %298 = vector.broadcast %297 : vector<16x1xf32> to vector<16x32xf32>
    %299 = arith.mulf %294, %298 : vector<16x32xf32>
    %300 = vector.broadcast %277 : vector<1x32xf32> to vector<16x32xf32>
    %301 = arith.mulf %299, %300 : vector<16x32xf32>
    %302 = vector.broadcast %279 : vector<1x32xf32> to vector<16x32xf32>
    %303 = arith.addf %301, %302 : vector<16x32xf32>
    %c1_119 = arith.constant 1 : index
    %c0_120 = arith.constant 0 : index
    %c0_121 = arith.constant 0 : index
    %304 = vector.load %arg15[%c1_119, %c0_120, %c0_121] : memref<2x32x64xbf16, #tpu.memory_space<vmem>>, vector<1x32x64xbf16>
    %305 = vector.shape_cast %304 : vector<1x32x64xbf16> to vector<32x64xbf16>
    %306 = arith.truncf %303 : vector<16x32xf32> to vector<16x32xbf16>
    %cst_122 = arith.constant dense<0.000000e+00> : vector<16x64xf32>
    %307 = tpu.matmul %306, %305, %cst_122 {dimension_numbers = #tpu.dot_dimension_numbers<[1], [0], [0], [1], [0, 0, 1, 1], [], []>} : vector<16x32xbf16>, vector<32x64xbf16>, vector<16x64xf32> -> vector<16x64xf32>
    %c1_123 = arith.constant 1 : index
    %c0_124 = arith.constant 0 : index
    %c0_125 = arith.constant 0 : index
    %308 = vector.load %arg16[%c1_123, %c0_124, %c0_125] : memref<2x1x64xf32, #tpu.memory_space<vmem>>, vector<1x1x64xf32>
    %309 = vector.shape_cast %308 : vector<1x1x64xf32> to vector<1x64xf32>
    %310 = vector.broadcast %309 : vector<1x64xf32> to vector<16x64xf32>
    %311 = arith.addf %307, %310 : vector<16x64xf32>
    %cst_126 = arith.constant 5.000000e-01 : f32
    %312 = vector.broadcast %cst_126 : f32 to vector<16x64xf32>
    %313 = arith.mulf %312, %311 : vector<16x64xf32>
    %cst_127 = arith.constant 4.471500e-02 : f32
    %314 = vector.broadcast %cst_127 : f32 to vector<16x64xf32>
    %315 = arith.mulf %314, %311 : vector<16x64xf32>
    %316 = arith.mulf %315, %311 : vector<16x64xf32>
    %317 = arith.mulf %316, %311 : vector<16x64xf32>
    %318 = arith.addf %311, %317 : vector<16x64xf32>
    %cst_128 = arith.constant 0.797884583 : f32
    %319 = vector.broadcast %cst_128 : f32 to vector<16x64xf32>
    %320 = arith.mulf %319, %318 : vector<16x64xf32>
    %321 = math.tanh %320 : vector<16x64xf32>
    %cst_129 = arith.constant 1.000000e+00 : f32
    %322 = vector.broadcast %cst_129 : f32 to vector<16x64xf32>
    %323 = arith.addf %322, %321 : vector<16x64xf32>
    %324 = arith.mulf %313, %323 : vector<16x64xf32>
    %c1_130 = arith.constant 1 : index
    %c0_131 = arith.constant 0 : index
    %c0_132 = arith.constant 0 : index
    %325 = vector.load %arg17[%c1_130, %c0_131, %c0_132] : memref<2x64x32xbf16, #tpu.memory_space<vmem>>, vector<1x64x32xbf16>
    %326 = vector.shape_cast %325 : vector<1x64x32xbf16> to vector<64x32xbf16>
    %327 = arith.truncf %324 : vector<16x64xf32> to vector<16x64xbf16>
    %cst_133 = arith.constant dense<0.000000e+00> : vector<16x32xf32>
    %328 = tpu.matmul %327, %326, %cst_133 {dimension_numbers = #tpu.dot_dimension_numbers<[1], [0], [0], [1], [0, 0, 1, 1], [], []>} : vector<16x64xbf16>, vector<64x32xbf16>, vector<16x32xf32> -> vector<16x32xf32>
    %c1_134 = arith.constant 1 : index
    %c0_135 = arith.constant 0 : index
    %c0_136 = arith.constant 0 : index
    %329 = vector.load %arg18[%c1_134, %c0_135, %c0_136] : memref<2x1x32xf32, #tpu.memory_space<vmem>>, vector<1x1x32xf32>
    %330 = vector.shape_cast %329 : vector<1x1x32xf32> to vector<1x32xf32>
    %331 = vector.broadcast %330 : vector<1x32xf32> to vector<16x32xf32>
    %332 = arith.addf %328, %331 : vector<16x32xf32>
    %333 = arith.addf %303, %332 : vector<16x32xf32>
    %c1_137 = arith.constant 1 : index
    %c0_138 = arith.constant 0 : index
    %c0_139 = arith.constant 0 : index
    %334 = vector.load %arg19[%c1_137, %c0_138, %c0_139] : memref<2x1x32xf32, #tpu.memory_space<vmem>>, vector<1x1x32xf32>
    %335 = vector.shape_cast %334 : vector<1x1x32xf32> to vector<1x32xf32>
    %c1_140 = arith.constant 1 : index
    %c0_141 = arith.constant 0 : index
    %c0_142 = arith.constant 0 : index
    %336 = vector.load %arg20[%c1_140, %c0_141, %c0_142] : memref<2x1x32xf32, #tpu.memory_space<vmem>>, vector<1x1x32xf32>
    %337 = vector.shape_cast %336 : vector<1x1x32xf32> to vector<1x32xf32>
    %cst_143 = arith.constant dense<0.000000e+00> : vector<16xf32>
    %338 = vector.multi_reduction <add>, %333, %cst_143 [1] : vector<16x32xf32> to vector<16xf32>
    %339 = vector.shape_cast %338 : vector<16xf32> to vector<16x1xf32>
    %cst_144 = arith.constant 3.200000e+01 : f32
    %340 = vector.broadcast %cst_144 : f32 to vector<16x1xf32>
    %341 = arith.divf %339, %340 : vector<16x1xf32>
    %342 = vector.broadcast %341 : vector<16x1xf32> to vector<16x32xf32>
    %343 = arith.subf %333, %342 : vector<16x32xf32>
    %344 = vector.broadcast %341 : vector<16x1xf32> to vector<16x32xf32>
    %345 = arith.subf %333, %344 : vector<16x32xf32>
    %346 = arith.mulf %343, %345 : vector<16x32xf32>
    %cst_145 = arith.constant dense<0.000000e+00> : vector<16xf32>
    %347 = vector.multi_reduction <add>, %346, %cst_145 [1] : vector<16x32xf32> to vector<16xf32>
    %348 = vector.shape_cast %347 : vector<16xf32> to vector<16x1xf32>
    %cst_146 = arith.constant 3.200000e+01 : f32
    %349 = vector.broadcast %cst_146 : f32 to vector<16x1xf32>
    %350 = arith.divf %348, %349 : vector<16x1xf32>
    %351 = vector.broadcast %341 : vector<16x1xf32> to vector<16x32xf32>
    %352 = arith.subf %333, %351 : vector<16x32xf32>
    %cst_147 = arith.constant 9.99999996E-13 : f32
    %353 = vector.broadcast %cst_147 : f32 to vector<16x1xf32>
    %354 = arith.addf %350, %353 : vector<16x1xf32>
    %355 = math.rsqrt %354 : vector<16x1xf32>
    %356 = vector.broadcast %355 : vector<16x1xf32> to vector<16x32xf32>
    %357 = arith.mulf %352, %356 : vector<16x32xf32>
    %358 = vector.broadcast %335 : vector<1x32xf32> to vector<16x32xf32>
    %359 = arith.mulf %357, %358 : vector<16x32xf32>
    %360 = vector.broadcast %337 : vector<1x32xf32> to vector<16x32xf32>
    %361 = arith.addf %359, %360 : vector<16x32xf32>
    %362 = vector.shape_cast %361 : vector<16x32xf32> to vector<2x8x32xf32>
    %363 = vector.extract_strided_slice %362 {offsets = [0, 0, 0], sizes = [2, 1, 32], strides = [1, 1, 1]} : vector<2x8x32xf32> to vector<2x1x32xf32>
    %364 = vector.shape_cast %363 : vector<2x1x32xf32> to vector<2x32xf32>
    %c0_148 = arith.constant 0 : index
    %c0_149 = arith.constant 0 : index
    %365 = vector.load %arg21[%c0_148, %c0_149] : memref<32x32xbf16, #tpu.memory_space<vmem>>, vector<32x32xbf16>
    %366 = arith.truncf %364 : vector<2x32xf32> to vector<2x32xbf16>
    %cst_150 = arith.constant dense<0.000000e+00> : vector<2x32xf32>
    %367 = tpu.matmul %366, %365, %cst_150 {dimension_numbers = #tpu.dot_dimension_numbers<[1], [0], [0], [1], [0, 0, 1, 1], [], []>} : vector<2x32xbf16>, vector<32x32xbf16>, vector<2x32xf32> -> vector<2x32xf32>
    %c0_151 = arith.constant 0 : index
    %c0_152 = arith.constant 0 : index
    %368 = vector.load %arg22[%c0_151, %c0_152] : memref<1x32xf32, #tpu.memory_space<vmem>>, vector<1x32xf32>
    %369 = vector.broadcast %368 : vector<1x32xf32> to vector<2x32xf32>
    %370 = arith.addf %367, %369 : vector<2x32xf32>
    %371 = math.tanh %370 : vector<2x32xf32>
    %c0_153 = arith.constant 0 : index
    %c0_154 = arith.constant 0 : index
    %c0_155 = arith.constant 0 : index
    %372 = vector.load %arg23[%c0_153, %c0_154, %c0_155] : memref<2x2x32xf32, #tpu.memory_space<vmem>>, vector<2x1x32xf32>
    %373 = vector.shape_cast %372 : vector<2x1x32xf32> to vector<2x32xf32>
    %374 = vector.shape_cast %364 : vector<2x32xf32> to vector<2x1x32xf32>
    tpu.vector_store %arg23[%c0_153, %c0_154, %c0_155], %374 {strides = array<i32>} : memref<2x2x32xf32, #tpu.memory_space<vmem>>, vector<2x1x32xf32>,
    %c0_156 = arith.constant 0 : index
    %c1_157 = arith.constant 1 : index
    %c0_158 = arith.constant 0 : index
    %375 = vector.load %arg23[%c0_156, %c1_157, %c0_158] : memref<2x2x32xf32, #tpu.memory_space<vmem>>, vector<2x1x32xf32>
    %376 = vector.shape_cast %375 : vector<2x1x32xf32> to vector<2x32xf32>
    %377 = vector.shape_cast %371 : vector<2x32xf32> to vector<2x1x32xf32>
    tpu.vector_store %arg23[%c0_156, %c1_157, %c0_158], %377 {strides = array<i32>} : memref<2x2x32xf32, #tpu.memory_space<vmem>>, vector<2x1x32xf32>,
    return
  }
  func.func @transform_0(%arg0: i32) -> (i32, i32) {
    %c0_i32 = arith.constant 0 : i32
    %c0_i32_0 = arith.constant 0 : i32
    return %arg0, %c0_i32 : i32, i32
  }
  func.func @transform_1(%arg0: i32) -> (i32, i32) {
    %c0_i32 = arith.constant 0 : i32
    %c0_i32_0 = arith.constant 0 : i32
    return %arg0, %c0_i32 : i32, i32
  }
  func.func @transform_2(%arg0: i32) -> (i32, i32, i32) {
    %c0_i32 = arith.constant 0 : i32
    %c0_i32_0 = arith.constant 0 : i32
    %c0_i32_1 = arith.constant 0 : i32
    return %arg0, %c0_i32, %c0_i32_0 : i32, i32, i32
  }
  func.func @transform_3(%arg0: i32) -> (i32, i32) {
    %c0_i32 = arith.constant 0 : i32
    %c0_i32_0 = arith.constant 0 : i32
    %c0_i32_1 = arith.constant 0 : i32
    return %c0_i32, %c0_i32_0 : i32, i32
  }
  func.func @transform_4(%arg0: i32) -> (i32, i32) {
    %c0_i32 = arith.constant 0 : i32
    %c0_i32_0 = arith.constant 0 : i32
    %c0_i32_1 = arith.constant 0 : i32
    return %c0_i32, %c0_i32_0 : i32, i32
  }
  func.func @transform_5(%arg0: i32) -> (i32, i32) {
    %c0_i32 = arith.constant 0 : i32
    %c0_i32_0 = arith.constant 0 : i32
    %c0_i32_1 = arith.constant 0 : i32
    return %c0_i32, %c0_i32_0 : i32, i32
  }
  func.func @transform_6(%arg0: i32) -> (i32, i32) {
    %c0_i32 = arith.constant 0 : i32
    %c0_i32_0 = arith.constant 0 : i32
    %c0_i32_1 = arith.constant 0 : i32
    return %c0_i32, %c0_i32_0 : i32, i32
  }
  func.func @transform_7(%arg0: i32) -> (i32, i32) {
    %c0_i32 = arith.constant 0 : i32
    %c0_i32_0 = arith.constant 0 : i32
    %c0_i32_1 = arith.constant 0 : i32
    return %c0_i32, %c0_i32_0 : i32, i32
  }
  func.func @transform_8(%arg0: i32) -> (i32, i32, i32) {
    %c0_i32 = arith.constant 0 : i32
    %c0_i32_0 = arith.constant 0 : i32
    %c0_i32_1 = arith.constant 0 : i32
    %c0_i32_2 = arith.constant 0 : i32
    return %c0_i32, %c0_i32_0, %c0_i32_1 : i32, i32, i32
  }
  func.func @transform_9(%arg0: i32) -> (i32, i32, i32) {
    %c0_i32 = arith.constant 0 : i32
    %c0_i32_0 = arith.constant 0 : i32
    %c0_i32_1 = arith.constant 0 : i32
    %c0_i32_2 = arith.constant 0 : i32
    return %c0_i32, %c0_i32_0, %c0_i32_1 : i32, i32, i32
  }
  func.func @transform_10(%arg0: i32) -> (i32, i32, i32) {
    %c0_i32 = arith.constant 0 : i32
    %c0_i32_0 = arith.constant 0 : i32
    %c0_i32_1 = arith.constant 0 : i32
    %c0_i32_2 = arith.constant 0 : i32
    return %c0_i32, %c0_i32_0, %c0_i32_1 : i32, i32, i32
  }
  func.func @transform_11(%arg0: i32) -> (i32, i32, i32) {
    %c0_i32 = arith.constant 0 : i32
    %c0_i32_0 = arith.constant 0 : i32
    %c0_i32_1 = arith.constant 0 : i32
    %c0_i32_2 = arith.constant 0 : i32
    return %c0_i32, %c0_i32_0, %c0_i32_1 : i32, i32, i32
  }
  func.func @transform_12(%arg0: i32) -> (i32, i32, i32) {
    %c0_i32 = arith.constant 0 : i32
    %c0_i32_0 = arith.constant 0 : i32
    %c0_i32_1 = arith.constant 0 : i32
    %c0_i32_2 = arith.constant 0 : i32
    return %c0_i32, %c0_i32_0, %c0_i32_1 : i32, i32, i32
  }
  func.func @transform_13(%arg0: i32) -> (i32, i32, i32) {
    %c0_i32 = arith.constant 0 : i32
    %c0_i32_0 = arith.constant 0 : i32
    %c0_i32_1 = arith.constant 0 : i32
    %c0_i32_2 = arith.constant 0 : i32
    return %c0_i32, %c0_i32_0, %c0_i32_1 : i32, i32, i32
  }
  func.func @transform_14(%arg0: i32) -> (i32, i32, i32) {
    %c0_i32 = arith.constant 0 : i32
    %c0_i32_0 = arith.constant 0 : i32
    %c0_i32_1 = arith.constant 0 : i32
    %c0_i32_2 = arith.constant 0 : i32
    return %c0_i32, %c0_i32_0, %c0_i32_1 : i32, i32, i32
  }
  func.func @transform_15(%arg0: i32) -> (i32, i32, i32) {
    %c0_i32 = arith.constant 0 : i32
    %c0_i32_0 = arith.constant 0 : i32
    %c0_i32_1 = arith.constant 0 : i32
    %c0_i32_2 = arith.constant 0 : i32
    return %c0_i32, %c0_i32_0, %c0_i32_1 : i32, i32, i32
  }
  func.func @transform_16(%arg0: i32) -> (i32, i32, i32) {
    %c0_i32 = arith.constant 0 : i32
    %c0_i32_0 = arith.constant 0 : i32
    %c0_i32_1 = arith.constant 0 : i32
    %c0_i32_2 = arith.constant 0 : i32
    return %c0_i32, %c0_i32_0, %c0_i32_1 : i32, i32, i32
  }
  func.func @transform_17(%arg0: i32) -> (i32, i32, i32) {
    %c0_i32 = arith.constant 0 : i32
    %c0_i32_0 = arith.constant 0 : i32
    %c0_i32_1 = arith.constant 0 : i32
    %c0_i32_2 = arith.constant 0 : i32
    return %c0_i32, %c0_i32_0, %c0_i32_1 : i32, i32, i32
  }
  func.func @transform_18(%arg0: i32) -> (i32, i32, i32) {
    %c0_i32 = arith.constant 0 : i32
    %c0_i32_0 = arith.constant 0 : i32
    %c0_i32_1 = arith.constant 0 : i32
    %c0_i32_2 = arith.constant 0 : i32
    return %c0_i32, %c0_i32_0, %c0_i32_1 : i32, i32, i32
  }
  func.func @transform_19(%arg0: i32) -> (i32, i32, i32) {
    %c0_i32 = arith.constant 0 : i32
    %c0_i32_0 = arith.constant 0 : i32
    %c0_i32_1 = arith.constant 0 : i32
    %c0_i32_2 = arith.constant 0 : i32
    return %c0_i32, %c0_i32_0, %c0_i32_1 : i32, i32, i32
  }
  func.func @transform_20(%arg0: i32) -> (i32, i32) {
    %c0_i32 = arith.constant 0 : i32
    %c0_i32_0 = arith.constant 0 : i32
    %c0_i32_1 = arith.constant 0 : i32
    return %c0_i32, %c0_i32_0 : i32, i32
  }
  func.func @transform_21(%arg0: i32) -> (i32, i32) {
    %c0_i32 = arith.constant 0 : i32
    %c0_i32_0 = arith.constant 0 : i32
    %c0_i32_1 = arith.constant 0 : i32
    return %c0_i32, %c0_i32_0 : i32, i32
  }
  func.func @transform_22(%arg0: i32) -> (i32, i32, i32) {
    %c0_i32 = arith.constant 0 : i32
    %c0_i32_0 = arith.constant 0 : i32
    %c0_i32_1 = arith.constant 0 : i32
    return %arg0, %c0_i32, %c0_i32_0 : i32, i32, i32
  }
}

</mosaic_0001>

<bundles_post_ra>
// kernel: _encode_jit.1
= control target key start
LH: loop header
LB: loop body
LE: loop exit
PB: predicated region body
PF: predicated region fallthrough
CT: control target
= control target key end

     0   :  { %v2618_v0 = vmov 0   ;;  %v2619_v9 = vmov 0.0   ;;  %vm134_vm2 = vcmask 1043456   ;;  %v74_v27 = vlaneseq  ;;  %s2623_s30 = smov 80   ;;  %s2625_s23 = smov 48   ;;  %s3221_s0 = inlined_call_operand.vmem [shape: s32[16,1], index: 0, kind: input, shape index: {}]   ;;  %s3222_s3 = inlined_call_operand.vmem [shape: f32[100,32], index: 3, kind: input, shape index: {}]   ;;  %s3223_s1 = inlined_call_operand.vmem [shape: s32[16,1], index: 1, kind: input, shape index: {}]   ;;  %s3224_s5 = inlined_call_operand.vmem [shape: f32[2,32], index: 5, kind: input, shape index: {}]   ;;  %s3225_s4 = inlined_call_operand.vmem [shape: f32[16,32], index: 4, kind: input, shape index: {}]   ;;  %s3226_s8 = inlined_call_operand.vmem [shape: bf16[2,32,96], index: 8, kind: input, shape index: {}]   ;;  %s3227_s6 = inlined_call_operand.vmem [shape: f32[1,32], index: 6, kind: input, shape index: {}]   ;;  %s3228_s7 = inlined_call_operand.vmem [shape: f32[1,32], index: 7, kind: input, shape index: {}]   ;;  %s3229_s9 = inlined_call_operand.vmem [shape: f32[2,1,96], index: 9, kind: input, shape index: {}]   ;;  %s3230_s2 = inlined_call_operand.vmem [shape: s32[2,1,8], index: 2, kind: input, shape index: {}]   ;;  %s3231_s10 = inlined_call_operand.vmem [shape: bf16[2,32,32], index: 10, kind: input, shape index: {}]   ;;  %s3232_s11 = inlined_call_operand.vmem [shape: f32[2,1,32], index: 11, kind: input, shape index: {}]   ;;  %s3233_s14 = inlined_call_operand.vmem [shape: bf16[2,32,64], index: 14, kind: input, shape index: {}]   ;;  %s3234_s12 = inlined_call_operand.vmem [shape: f32[2,1,32], index: 12, kind: input, shape index: {}]   ;;  %s3235_s13 = inlined_call_operand.vmem [shape: f32[2,1,32], index: 13, kind: input, shape index: {}]   ;;  %s3236_s16 = inlined_call_operand.vmem [shape: bf16[2,64,32], index: 16, kind: input, shape index: {}]   ;;  %s3237_s15 = inlined_call_operand.vmem [shape: f32[2,1,64], index: 15, kind: input, shape index: {}]   ;;  %s3238_s17 = inlined_call_operand.vmem [shape: f32[2,1,32], index: 17, kind: input, shape index: {}]   ;;  %s3239_s18 = inlined_call_operand.vmem [shape: f32[2,1,32], index: 18, kind: input, shape index: {}]   ;;  %s3240_s19 = inlined_call_operand.vmem [shape: f32[2,1,32], index: 19, kind: input, shape index: {}]   ;;  %s3241_s20 = inlined_call_operand.vmem [shape: bf16[32,32], index: 20, kind: input, shape index: {}]   ;;  %s3242_s22 = inlined_call_operand.vmem [shape: f32[2,2,32], index: 22, kind: output, shape index: {}]   ;;  %s3243_s21 = inlined_call_operand.vmem [shape: f32[1,32], index: 21, kind: input, shape index: {}]  }
   0x1   :  { %3249 = sst [smem:[#allocation2_spill]] %s3221_s0  ;;  %2522 = vset.pattern.permute.xlu0 %v2618_v0  ;;  %2523 = vset.pattern.permute.xlu1 %v2618_v0  ;;  %vm127_vm3 = vcmask 818176   ;;  %vm218_vm8 = vcmask 261120   ;;  %vm2620_vm9 = vmmov 0   ;;  %vm355_vm10 = vcmask 130048  }
   0x2   :  { %3250 = sst [smem:[#allocation3_spill]] %s3222_s3  ;;  %s3256_s29 = sld [smem:[#allocation2_spill]]  ;;  %2312 = vmatprep.subr.bf16.mxu1 %v2619_v9  ;;  %v75_v28 = vand.u32 127, %v74_v27  ;;  %2316 = vmatprep.mubr.msk.bf16.mxu1 %vm2620_vm9, %v2619_v9  ;;  %vm451_vm11 = vcmask 64512   ;;  %vm1042_vm12 = vcmask 523264   ;;  %vm2070_vm13 = vcmask 253952  }
   0x3   :  { %3251 = sst [smem:[#allocation4_spill]] %s3223_s1  ;;  %s3257_s0 = sld [smem:[#allocation3_spill]]  ;;  %vm2011_vm14 = vcmask 1041409  }
   0x4   :  { %3252 = sst [smem:[#allocation5_spill]] %s3224_s5 }
   0x5   :  { %3253 = sst [smem:[#allocation6_spill]] %s3225_s4 }
   0x6   :  { %3254 = sst [smem:[#allocation7_spill]] %s3226_s8  ;;  %s3260_s5 = sld [smem:[#allocation6_spill]] }
   0x7   :  { %3255 = sst [smem:[#allocation8_spill]] %s3227_s6  ;;  %s3258_s6 = sld [smem:[#allocation4_spill]] }
   0x8   :  { %v72_v1 = vld [vmem:[%s3256_s29] sm:$0xff]  ;;  %v73_v6 = vld [vmem:[%s3256_s29 + $0x8] sm:$0xff]  ;;  %s3261_s4 = sld [smem:[#allocation7_spill]]  ;;  %s2624_s29 = smov 112  }
   0x9   :  { %v88_v2 = vld [vmem:[%s3257_s0] sm:$0xff]  ;;  %77 = vperm.xlu0 %2522, %v72_v1   ;;  %v89_v3 = vld [vmem:[%s3257_s0 + $0x8] sm:$0xff]  ;;  %v90_v4 = vld [vmem:[%s3257_s0 + $0x10] sm:$0xff] }
   0xa   :  { %v91_v5 = vld [vmem:[%s3257_s0 + $0x18] sm:$0xff]  ;;  %v2488_v7 = vpack.c.bf16 %v89_v3, %v88_v2  ;;  %v92_v10 = vld [vmem:[%s3257_s0 + $0x20] sm:$0xff]  ;;  %v93_v11 = vld [vmem:[%s3257_s0 + $0x28] sm:$0xff] }
   0xb   :  { %v2492_v8 = vpack.c.bf16 %v91_v5, %v90_v4  ;;  %v2496_v12 = vpack.c.bf16 %v93_v11, %v92_v10  ;;  %v94_v13 = vld [vmem:[%s3257_s0 + $0x30] sm:$0xff]  ;;  %v95_v14 = vld [vmem:[%s3257_s0 + $0x38] sm:$0xff]  ;;  %v96_v19 = vld [vmem:[%s3257_s0 + $0x40] sm:$0xff] }
   0xc   :  { %2489 = vmatprep.subr.bf16.mxu0 %v2488_v7  ;;  %v2500_v17 = vpack.c.bf16 %v95_v14, %v94_v13  ;;  %v97_v20 = vld [vmem:[%s3257_s0 + $0x48] sm:$0xff]  ;;  %v98_v23 = vld [vmem:[%s3257_s0 + $0x50] sm:$0xff]  ;;  %v99_v24 = vld [vmem:[%s3257_s0 + $0x58] sm:$0xff] }
   0xd   :  { %80 = vperm.xlu0 %2522, %v73_v6   ;;  %2491 = vmatpush3.bf16.msra.mxu0 %v2488_v7  ;;  %v101_v15 = vld [vmem:[%s3258_s6] sm:$0xff]  ;;  %v102_v16 = vld [vmem:[%s3258_s6 + $0x8] sm:$0xff]  ;;  %v2504_v22 = vpack.c.bf16 %v97_v20, %v96_v19  ;;  %v2508_v25 = vpack.c.bf16 %v99_v24, %v98_v23  ;;  %s3259_s6 = sld [smem:[#allocation5_spill]] }
   0xe   :  { %2493 = vmatprep.subr.bf16.mxu0 %v2492_v8  ;;  %vm103_vm0 = vcmp.eq.s32.totalorder %v101_v15, 0  ;;  %vm104_vm1 = vcmp.eq.s32.totalorder %v102_v16, 0  ;;  %v100_v26 = vld [vmem:[%s3257_s0 + $0x60] sm:$0xf]  ;;  %v2535_v59 = vld [vmem:[%s3261_s4 + $0x8] sm:$0xff]   ;;  %s3262_s0 = sld [smem:[#allocation8_spill]] }
   0xf   :  { %v107_v18 = vsel %vm103_vm0, 1, %v2618_v0  ;;  %v108_v21 = vsel %vm104_vm1, 1, %v2618_v0  ;;  %v213_v40 = vld [vmem:[%s3260_s5] sm:$0xff] }
  0x10   :  { %110 = vperm.xlu1 %2523, %v107_v18   ;;  %v2534_v58 = vld [vmem:[%s3261_s4] sm:$0xff]  }
  0x11   :  { %2495 = vmatpush3.bf16.msra.mxu0 %v2492_v8  ;;  %2313 = vmatpush3.bf16.msra.mxu1 %v2534_v58  ;;  %v2112_v8 = vld [vmem:[%s3228_s7] ss:$0 sm:$0xff]  ;;  %s2621_s7 = smov 96  }
  0x12   :  { %2497 = vmatprep.subr.bf16.mxu0 %v2496_v12  ;;  %2314 = vmatprep.subr.bf16.mxu1 %v2619_v9  ;;  %v2113_v14 = vld [vmem:[%s3229_s9] ss:$0 sm:$0xff] }
  0x13   :  { %v2106_v35 = vld [vmem:[%s3259_s6] ss:$0 sm:$0xff]  ;;  %v2107_v36 = vld [vmem:[%s3259_s6 + $0x1] ss:$0 sm:$0xff]  ;;  %s2626_s6 = smov 16  }
  0x14   :  { %113 = vperm.xlu1 %2523, %v108_v21   ;;  %v2111_v4 = vld [vmem:[%s3262_s0] ss:$0 sm:$0xff] }
  0x15   :  { %2499 = vmatpush3.bf16.msra.mxu0 %v2496_v12  ;;  %2315 = vmatpush3.bf16.msra.mxu1 %v2535_v59 }
  0x16   :  { %2501 = vmatprep.subr.bf16.mxu0 %v2500_v17  ;;  %2320 = vmatprep.subr.bf16.mxu1 %v2619_v9 }
  0x19   :  { %2503 = vmatpush3.bf16.msra.mxu0 %v2500_v17 }
  0x1a   :  { %2505 = vmatprep.subr.bf16.mxu0 %v2504_v22 }
  0x1d   :  { %2507 = vmatpush3.bf16.msra.mxu0 %v2504_v22 }
  0x1e   :  { %2509 = vmatprep.subr.bf16.mxu0 %v2508_v25 }
  0x21   :  { %2511 = vmatpush3.bf16.msra.mxu0 %v2508_v25 }
  0x22   :  { %2307 = vmatprep.subr.msk.mxu0 %vm134_vm2, %v100_v26 }
  0x25   :  { %2308 = vmatpush3.msk.msra.mxu0 %vm134_vm2, %v100_v26 }
  0x26   :  { %2332 = vmatprep.subr.bf16.mxu0 %v2619_v9 }
  0x88   :  { %v78_v29 = vpop.permute.xlu0 %77 }
  0x89   :  { %vm82_vm4 = vcmp.eq.s32.totalorder %v78_v29, %v75_v28 }
  0x8a   :  { %v2104_v30 = vsel %vm82_vm4, 1.0, %v2619_v9 }
  0x8b   :  { %2309 = vmatprep.mubr.msk.f32.mxu0 %vm127_vm3, %v2104_v30  ;;  %v2868_v30 = vshrl.u32 %v74_v27, 7 }
  0x8c   :  { %v81_v31 = vpop.permute.xlu0 %80 }
  0x8d   :  { %vm83_vm5 = vcmp.eq.s32.totalorder %v81_v31, %v75_v28  ;;  %v262_v28 = vld [vmem:[%s3230_s2] sm:$0x1] }
  0x8e   :  { %v2105_v32 = vsel %vm83_vm5, 1.0, %v2619_v9  ;;  %v264_v29 = vcvt.s32.f32 %v262_v28 }
  0x8f   :  { %2310 = vmatmul.mubr.msk.f32.vlgmr.msra.gmra.mrb[0].mxu0 %vm127_vm3, %v2105_v32  ;;  %v111_v33 = vpop.permute.xlu1 %110  ;;  %v263_v32 = vld [vmem:[%s3230_s2 + $0x1] sm:$0x1]  ;;  %s2622_s2 = smov 64  }
  0x90   :  { %vm115_vm7 = vcmp.eq.s32.totalorder %v111_v33, 1  ;;  %2334 = vmatprep.mubr.msk.bf16.mxu0 %vm2620_vm9, %v2619_v9  ;;  %v266_v31 = vsub.f32 1.0, %v264_v29  ;;  %v344_v33 = vsub.s32 0, %v2868_v30 }
  0x91   :  { %v125_v38 = vsel %vm115_vm7, %v2106_v35, %v2107_v36 }
  0x93   :  { %v114_v34 = vpop.permute.xlu1 %113 }
  0x94   :  { %vm116_vm6 = vcmp.eq.s32.totalorder %v114_v34, 1  ;;  %v268_v34 = vmul.f32 -10000.0, %v266_v31 }
  0x95   :  { %v126_v37 = vsel %vm116_vm6, %v2106_v35, %v2107_v36  ;;  %v265_v35 = vcvt.s32.f32 %v263_v32 }
  0x96   :  { %v2874_v36 = vrot.slane %v268_v34, %v344_v33 }
 0x162   :  { %v2311_v39 = vpop.f32.mrb[0].mxu0 }
 0x163   :  { %v210_v41 = vadd.f32 %v2311_v39, %v126_v37  ;;  %v204_v42 = vpop.f32.mrb[1].mxu0  ;;  %v267_v37 = vsub.f32 1.0, %v265_v35 }
 0x164   :  { %v205_v43 = vadd.f32 %v204_v42, %v125_v38 }
 0x165   :  { %v215_v44 = vadd.f32 %v213_v40, %v210_v41  ;;  %v269_v41 = vmul.f32 -10000.0, %v267_v37 }
 0x166   :  { %v214_v45 = vadd.f32 %v213_v40, %v205_v43 }
 0x167   :  { %v222_v46 = vsel %vm218_vm8, %v215_v44, 0.0 }
 0x168   :  { %223 = vadd.xlane.f32.xlu1 %v222_v46  ;;  %v219_v47 = vsel %vm218_vm8, %v214_v45, 0.0 }
 0x169   :  { %220 = vadd.xlane.f32.xlu0 %v219_v47 }
 0x1f5   :  { %v224_v48 = vpop.xlane.xlu1 %223 }
 0x1f6   :  { %v227_v49 = vmul.f32 0.03125, %v224_v48  ;;  %v221_v50 = vpop.xlane.xlu0 %220 }
 0x1f7   :  { %v226_v51 = vmul.f32 0.03125, %v221_v50 }
 0x1f8   :  { %v229_v52 = vsub.f32 %v215_v44, %v227_v49  ;;  %v2878_v44 = vrot.slane %v269_v41, %v344_v33 }
 0x1f9   :  { %v228_v53 = vsub.f32 %v214_v45, %v226_v51 }
 0x1fa   :  { %v231_v56 = vmul.f32 %v229_v52, %v229_v52 }
 0x1fb   :  { %v230_v54 = vmul.f32 %v228_v53, %v228_v53 }
 0x1fc   :  { %v235_v57 = vsel %vm218_vm8, %v231_v56, 0.0 }
 0x1fd   :  { %v232_v55 = vsel %vm218_vm8, %v230_v54, 0.0 }
 0x1fe   :  { %233 = vadd.xlane.f32.xlu0 %v232_v55 }
 0x202   :  { %236 = vadd.xlane.f32.xlu0 %v235_v57 }
 0x28b   :  { %v234_v60 = vpop.xlane.xlu0 %233 }
 0x28c   :  { %v238_v61 = vmul.f32 0.03125, %v234_v60 }
 0x28e   :  { %v240_v62 = vadd.f32 1e-12, %v238_v61 }
 0x28f   :  { %v237_v63 = vpop.xlane.xlu0 %236 }
 0x290   :  { %2556 = vrsqrt.f32 %v240_v62  ;;  %v239_v0 = vmul.f32 0.03125, %v237_v63 }
 0x292   :  { %v241_v1 = vadd.f32 1e-12, %v239_v0 }
 0x294   :  { %2558 = vrsqrt.f32 %v241_v1 }
 0x29a   :  { %v2557_v2 = vpop.eup %2556 }
 0x29b   :  { %v244_v3 = vmul.f32 %v2557_v2, %v228_v53 }
 0x29d   :  { %v252_v7 = vmul.f32 %v2111_v4, %v244_v3 }
 0x29e   :  { %v2559_v5 = vpop.eup %2558 }
 0x29f   :  { %v245_v6 = vmul.f32 %v2559_v5, %v229_v52  ;;  %v2832_v11 = vadd.f32 %v2112_v8, %v252_v7 }
 0x2a1   :  { %v253_v10 = vmul.f32 %v2111_v4, %v245_v6 }
 0x2a3   :  { %v2834_v12 = vadd.f32 %v2112_v8, %v253_v10 }
 0x2a5   :  { %v274_v13 = vpack.c.bf16 %v2834_v12, %v2832_v11 }
 0x2a7   :  { %2317 = vmatmul.mubr.msk.bf16.vlgmr.msra.gmra.mrb[0].mxu1 %vm218_vm8, %v274_v13 }
 0x2a8   :  { %2322 = vmatprep.mubr.msk.bf16.mxu1 %vm2620_vm9, %v2619_v9 }
 0x37a   :  { %v331_v15 = vpop.f32.mrb[0].mxu1 }
 0x37b   :  { %v332_v16 = vadd.f32 %v2113_v14, %v331_v15  ;;  %v2318_v17 = vpop.f32.mrb[1].mxu1 }
 0x37c   :  { %v334_v18 = vpop.f32.mrb[2].mxu1 }
 0x37d   :  { %v2844_v19 = vpack.c.bf16 %v332_v16, %v332_v16  ;;  %v335_v20 = vadd.f32 %v2113_v14, %v334_v18  ;;  %v2319_v21 = vpop.f32.mrb[3].mxu1 }
 0x37f   :  { %v2846_v22 = vpack.c.bf16 %v335_v20, %v335_v20  ;;  %353 = vrot.lane.b32.xlu1 %v2844_v19, %s2621_s7 }
 0x381   :  { %403 = vrot.lane.b32.xlu0 %v2846_v22, %s2621_s7 }
 0x3f1   :  { %v354_v23 = vpop.permute.xlu1 %353 }
 0x3f2   :  { %v360_v24 = vsel %vm355_vm10, %v354_v23, 0 }
 0x3f3   :  { %2321 = vmatpush3.bf16.xpose.msra.mxu1 %v360_v24  ;;  %v404_v25 = vpop.permute.xlu0 %403 }
 0x3f4   :  { %2326 = vmatprep.subr.bf16.mxu1 %v2619_v9  ;;  %v409_v26 = vsel %vm355_vm10, %v404_v25, 0 }
 0x3fa   :  { %2323 = vmatmul.mubr.msk.bf16.vlgmr.msra.gmra.mrb[4].mxu1 %vm355_vm10, %v2844_v19 }
 0x3fb   :  { %2327 = vmatpush3.bf16.xpose.msra.mxu1 %v409_v26  ;;  %2328 = vmatprep.mubr.msk.bf16.mxu1 %vm2620_vm9, %v2619_v9 }
 0x3fc   :  { %2338 = vmatprep.subr.bf16.mxu1 %v2619_v9 }
 0x402   :  { %2329 = vmatmul.mubr.msk.bf16.vlgmr.msra.gmra.mrb[8].mxu1 %vm355_vm10, %v2846_v22 }
 0x403   :  { %2340 = vmatprep.mubr.msk.bf16.mxu1 %vm2620_vm9, %v2619_v9 }
 0x4cd   :  { %v396_v38 = vpop.f32.mrb[4].mxu1 }
 0x4ce   :  { %v397_v39 = vadd.f32 %v396_v38, %v2874_v36  ;;  %v2324_v40 = vpop.f32.mrb[5].mxu1 }
 0x4cf   :  { %v399_v27 = vpop.f32.mrb[6].mxu1 }
 0x4d0   :  { %v2325_v42 = vpop.f32.mrb[7].mxu1  ;;  %v452_v43 = vsel %vm451_vm11, %v397_v39, -inf }
 0x4d1   :  { %453 = vmax.xlane.f32.xlu1 %v452_v43 }
 0x4d5   :  { %v445_v45 = vpop.f32.mrb[8].mxu1 }
 0x4d6   :  { %v446_v46 = vadd.f32 %v445_v45, %v2878_v44  ;;  %v2330_v47 = vpop.f32.mrb[9].mxu1 }
 0x4d7   :  { %v448_v48 = vpop.f32.mrb[10].mxu1 }
 0x4d8   :  { %v2331_v49 = vpop.f32.mrb[11].mxu1  ;;  %v455_v50 = vsel %vm451_vm11, %v446_v46, -inf }
 0x4d9   :  { %456 = vmax.xlane.f32.xlu0 %v455_v50 }
 0x4e2   :  { %476 = vrot.lane.b32.xlu1 %v2844_v19, %s2622_s2 }
 0x55e   :  { %v454_v51 = vpop.xlane.xlu1 %453 }
 0x55f   :  { %v458_v52 = vsub.f32 %v397_v39, %v454_v51 }
 0x561   :  { %v460_v53 = vmul.f32 1.442695, %v458_v52 }
 0x562   :  { %v477_v54 = vpop.permute.xlu1 %476 }
 0x563   :  { %2560 = vpow2.f32 %v460_v53  ;;  %v482_v55 = vsel %vm134_vm2, %v477_v54, 0 }
 0x564   :  { %2333 = vmatpush3.bf16.msra.mxu0 %v482_v55 }
 0x565   :  { %2344 = vmatprep.subr.bf16.mxu0 %v2619_v9 }
 0x566   :  { %v457_v56 = vpop.xlane.xlu0 %456 }
 0x567   :  { %v459_v57 = vsub.f32 %v446_v46, %v457_v56 }
 0x569   :  { %v462_v58 = vmul.f32 1.442695, %v459_v57 }
 0x56b   :  { %2562 = vpow2.f32 %v462_v58 }
 0x56d   :  { %v2561_v59 = vpop.eup %2560 }
 0x56e   :  { %v464_v60 = vsel %vm451_vm11, %v2561_v59, 0.0 }
 0x56f   :  { %465 = vadd.xlane.f32.xlu1 %v464_v60 }
 0x575   :  { %v2563_v61 = vpop.eup %2562 }
 0x576   :  { %v467_v62 = vsel %vm451_vm11, %v2563_v61, 0.0 }
 0x577   :  { %468 = vadd.xlane.f32.xlu0 %v467_v62 }
 0x580   :  { %574 = vrot.lane.b32.xlu1 %v2844_v19, %s2623_s30 }
 0x584   :  { %624 = vrot.lane.b32.xlu1 %v2846_v22, %s2623_s30 }
 0x588   :  { %622 = vrot.lane.b32.xlu1 %v2846_v22, %s2624_s29 }
 0x58d   :  { %524 = vrot.lane.b32.xlu0 %v2846_v22, %s2622_s2 }
 0x591   :  { %572 = vrot.lane.b32.xlu0 %v2844_v19, %s2624_s29 }
 0x5fc   :  { %v466_v63 = vpop.xlane.xlu1 %465 }
 0x5fd   :  { %2564 = vrcp.f32 %v466_v63  ;;  %v2536_v63 = vld [vmem:[%s3231_s10] sm:$0xff]  }
 0x600   :  { %v575_v4 = vpop.permute.xlu1 %574 }
 0x601   :  { %v580_v7 = vsel %vm355_vm10, %v575_v4, 0 }
 0x604   :  { %v469_v0 = vpop.xlane.xlu0 %468  ;;  %v625_v13 = vpop.permute.xlu1 %624 }
 0x605   :  { %2566 = vrcp.f32 %v469_v0  ;;  %v630_v16 = vsel %vm355_vm10, %v625_v13, 0  ;;  %v2537_v0 = vld [vmem:[%s3231_s10 + $0x8] sm:$0xff]  }
 0x607   :  { %v2565_v1 = vpop.eup %2564 }
 0x608   :  { %v472_v2 = vmul.f32 %v2565_v1, %v2561_v59  ;;  %v525_v3 = vpop.permute.xlu0 %524  ;;  %v623_v17 = vpop.permute.xlu1 %622 }
 0x609   :  { %v530_v5 = vsel %vm134_vm2, %v525_v3, 0 }
 0x60a   :  { %2339 = vmatpush3.bf16.msra.mxu1 %v530_v5  ;;  %v474_v6 = vpack.c.bf16 %v472_v2, %v472_v2 }
 0x60b   :  { %2350 = vmatprep.subr.bf16.mxu1 %v2619_v9 }
 0x60c   :  { %2335 = vmatmul.mubr.msk.bf16.vlgmr.msra.gmra.mrb[4].mxu0 %vm451_vm11, %v474_v6  ;;  %v573_v15 = vpop.permute.xlu0 %572 }
 0x60d   :  { %2345 = vmatpush3.bf16.xpose.msra.mxu0 %v580_v7  ;;  %2346 = vmatprep.mubr.msk.bf16.mxu0 %vm2620_vm9, %v2619_v9 }
 0x60e   :  { %2356 = vmatprep.subr.bf16.mxu0 %v2619_v9 }
 0x60f   :  { %v2567_v8 = vpop.eup %2566 }
 0x610   :  { %v473_v10 = vmul.f32 %v2567_v8, %v2563_v61 }
 0x612   :  { %v475_v14 = vpack.c.bf16 %v473_v10, %v473_v10 }
 0x614   :  { %2341 = vmatmul.mubr.msk.bf16.vlgmr.msra.gmra.mrb[12].mxu1 %vm451_vm11, %v475_v14  ;;  %2347 = vmatmul.mubr.msk.bf16.vlgmr.msra.gmra.mrb[8].mxu0 %vm355_vm10, %v573_v15 }
 0x615   :  { %2351 = vmatpush3.bf16.xpose.msra.mxu1 %v630_v16  ;;  %2352 = vmatprep.mubr.msk.bf16.mxu1 %vm2620_vm9, %v2619_v9 }
 0x616   :  { %2362 = vmatprep.subr.bf16.mxu1 %v2619_v9  ;;  %2358 = vmatprep.mubr.msk.bf16.mxu0 %vm2620_vm9, %v2619_v9 }
 0x61c   :  { %2353 = vmatmul.mubr.msk.bf16.vlgmr.msra.gmra.mrb[16].mxu1 %vm355_vm10, %v623_v17 }
 0x61d   :  { %2364 = vmatprep.mubr.msk.bf16.mxu1 %vm2620_vm9, %v2619_v9 }
 0x6df   :  { %v2916_v18 = vpop.f32.mrb[4].mxu0 }
 0x6e0   :  { %v2336_v20 = vpop.f32.mrb[5].mxu0 }
 0x6e1   :  { %v521_v21 = vpop.f32.mrb[6].mxu0 }
 0x6e2   :  { %v2337_v23 = vpop.f32.mrb[7].mxu0  ;;  %v2125_v21 = vld [vmem:[%s3232_s11] ss:$0 sm:$0xff] }
 0x6e7   :  { %v2918_v24 = vpop.f32.mrb[12].mxu1  ;;  %v616_v25 = vpop.f32.mrb[8].mxu0 }
 0x6e8   :  { %v617_v26 = vadd.f32 %v616_v25, %v2874_v36  ;;  %v2342_v28 = vpop.f32.mrb[13].mxu1  ;;  %v2348_v29 = vpop.f32.mrb[9].mxu0 }
 0x6e9   :  { %v569_v31 = vpop.f32.mrb[14].mxu1  ;;  %v619_v32 = vpop.f32.mrb[10].mxu0 }
 0x6ea   :  { %v2343_v33 = vpop.f32.mrb[15].mxu1  ;;  %v2349_v34 = vpop.f32.mrb[11].mxu0  ;;  %v672_v35 = vsel %vm451_vm11, %v617_v26, -inf }
 0x6eb   :  { %673 = vmax.xlane.f32.xlu0 %v672_v35 }
 0x6ef   :  { %v666_v37 = vpop.f32.mrb[16].mxu1 }
 0x6f0   :  { %v667_v38 = vadd.f32 %v666_v37, %v2878_v44  ;;  %v2354_v39 = vpop.f32.mrb[17].mxu1 }
 0x6f1   :  { %v669_v40 = vpop.f32.mrb[18].mxu1 }
 0x6f2   :  { %v2355_v41 = vpop.f32.mrb[19].mxu1  ;;  %v675_v27 = vsel %vm451_vm11, %v667_v38, -inf }
 0x6f3   :  { %676 = vmax.xlane.f32.xlu1 %v675_v27 }
 0x704   :  { %696 = vrot.lane.b32.xlu1 %v2844_v19, %s2625_s23 }
 0x778   :  { %v674_v42 = vpop.xlane.xlu0 %673 }
 0x779   :  { %v678_v43 = vsub.f32 %v617_v26, %v674_v42 }
 0x77b   :  { %v680_v45 = vmul.f32 1.442695, %v678_v43  ;;  %v2539_v43 = vld [vmem:[%s3233_s14 + $0x8] sm:$0xff]  }
 0x77d   :  { %2568 = vpow2.f32 %v680_v45 }
 0x780   :  { %v677_v46 = vpop.xlane.xlu1 %676 }
 0x781   :  { %v679_v47 = vsub.f32 %v667_v38, %v677_v46 }
 0x783   :  { %v682_v48 = vmul.f32 1.442695, %v679_v47 }
 0x784   :  { %v697_v49 = vpop.permute.xlu1 %696 }
 0x785   :  { %2570 = vpow2.f32 %v682_v48  ;;  %v702_v50 = vsel %vm134_vm2, %v697_v49, 0 }
 0x786   :  { %2357 = vmatpush3.bf16.msra.mxu0 %v702_v50 }
 0x787   :  { %v2569_v51 = vpop.eup %2568  ;;  %2368 = vmatprep.subr.bf16.mxu0 %v2619_v9 }
 0x788   :  { %v684_v52 = vsel %vm451_vm11, %v2569_v51, 0.0 }
 0x789   :  { %685 = vadd.xlane.f32.xlu0 %v684_v52  ;;  %v2129_v52 = vld [vmem:[%s3234_s12] ss:$0 sm:$0xff] }
 0x78f   :  { %v2571_v53 = vpop.eup %2570 }
 0x790   :  { %v687_v19 = vsel %vm451_vm11, %v2571_v53, 0.0 }
 0x791   :  { %688 = vadd.xlane.f32.xlu0 %v687_v19 }
 0x7a7   :  { %744 = vrot.lane.b32.xlu0 %v2846_v22, %s2625_s23 }
 0x816   :  { %v686_v54 = vpop.xlane.xlu0 %685 }
 0x817   :  { %2572 = vrcp.f32 %v686_v54 }
 0x81e   :  { %v689_v55 = vpop.xlane.xlu0 %688 }
 0x81f   :  { %2574 = vrcp.f32 %v689_v55 }
 0x821   :  { %v2573_v56 = vpop.eup %2572 }
 0x822   :  { %v692_v57 = vmul.f32 %v2573_v56, %v2569_v51  ;;  %v745_v58 = vpop.permute.xlu0 %744  ;;  %v2130_v56 = vld [vmem:[%s3235_s13] ss:$0 sm:$0xff] }
 0x823   :  { %v750_v59 = vsel %vm134_vm2, %v745_v58, 0 }
 0x824   :  { %2363 = vmatpush3.bf16.msra.mxu1 %v750_v59  ;;  %v694_v60 = vpack.c.bf16 %v692_v57, %v692_v57 }
 0x825   :  { %2376 = vmatprep.subr.bf16.mxu1 %v2619_v9 }
 0x826   :  { %2359 = vmatmul.mubr.msk.bf16.vlgmr.msra.gmra.mrb[12].mxu0 %vm451_vm11, %v694_v60 }
 0x827   :  { %2372 = vmatprep.mubr.msk.bf16.mxu0 %vm2620_vm9, %v2619_v9  ;;  %2369 = vmatpush3.bf16.msra.mxu0 %v2536_v63  ;;  %v2543_v63 = vld [vmem:[%s3236_s16 + $0x18] sm:$0xff]  }
 0x828   :  { %2370 = vmatprep.subr.bf16.mxu0 %v2619_v9 }
 0x829   :  { %v2575_v61 = vpop.eup %2574 }
 0x82a   :  { %v693_v22 = vmul.f32 %v2575_v61, %v2571_v53  ;;  %v2540_v61 = vld [vmem:[%s3236_s16] sm:$0xff]  }
 0x82b   :  { %2371 = vmatpush3.bf16.msra.mxu0 %v2537_v0  ;;  %v2131_v0 = vld [vmem:[%s3237_s15] ss:$0 sm:$0xff] }
 0x82c   :  { %v695_v62 = vpack.c.bf16 %v693_v22, %v693_v22  ;;  %2384 = vmatprep.subr.bf16.mxu0 %v2619_v9  ;;  %v2541_v22 = vld [vmem:[%s3236_s16 + $0x8] sm:$0xff]  }
 0x82e   :  { %2365 = vmatmul.mubr.msk.bf16.vlgmr.msra.gmra.mrb[20].mxu1 %vm451_vm11, %v695_v62  ;;  %v2542_v62 = vld [vmem:[%s3236_s16 + $0x10] sm:$0xff]  }
 0x82f   :  { %2380 = vmatprep.mubr.msk.bf16.mxu1 %vm2620_vm9, %v2619_v9 }
 0x8f9   :  { %v738_v1 = vpop.f32.mrb[12].mxu0 }
 0x8fa   :  { %v2360_v2 = vpop.f32.mrb[13].mxu0 }
 0x8fb   :  { %v741_v3 = vpop.f32.mrb[14].mxu0 }
 0x8fc   :  { %v2361_v4 = vpop.f32.mrb[15].mxu0 }
 0x901   :  { %v786_v5 = vpop.f32.mrb[20].mxu1 }
 0x902   :  { %v2524_v6 = vpack.i.bf16 %v786_v5, %v738_v1  ;;  %v2366_v7 = vpop.f32.mrb[21].mxu1 }
 0x903   :  { %v789_v8 = vpop.f32.mrb[22].mxu1 }
 0x904   :  { %2525 = vrot.lane.b32.xlu1 %v2524_v6, %s2626_s6  ;;  %v2367_v10 = vpop.f32.mrb[23].mxu1 }
 0x976   :  { %v2526_v13 = vpop.permute.xlu1 %2525 }
 0x977   :  { %v2528_v14 = vunpack.i.h.bf16 %v2526_v13  ;;  %v2527_v15 = vunpack.i.l.bf16 %v2526_v13 }
 0x979   :  { %v801_v16 = vsel %vm355_vm10, %v2918_v24, %v2528_v14  ;;  %v800_v17 = vsel %vm355_vm10, %v2916_v18, %v2527_v15 }
 0x97a   :  { %v806_v20 = vpack.c.bf16 %v801_v16, %v800_v17 }
 0x97c   :  { %2373 = vmatmul.mubr.msk.bf16.vlgmr.msra.gmra.mrb[16].mxu0 %vm218_vm8, %v806_v20 }
 0x97d   :  { %2392 = vmatprep.mubr.msk.bf16.mxu0 %vm2620_vm9, %v2619_v9  ;;  %2385 = vmatpush3.bf16.msra.mxu0 %v2540_v61  ;;  %v2141_v61 = vld [vmem:[%s3239_s18] ss:$0 sm:$0xff] }
 0x97e   :  { %2386 = vmatprep.subr.bf16.mxu0 %v2619_v9 }
 0x981   :  { %2387 = vmatpush3.bf16.msra.mxu0 %v2541_v22 }
 0x982   :  { %2388 = vmatprep.subr.bf16.mxu0 %v2619_v9 }
 0x985   :  { %2389 = vmatpush3.bf16.msra.mxu0 %v2542_v62 }
 0x986   :  { %2390 = vmatprep.subr.bf16.mxu0 %v2619_v9 }
 0x989   :  { %2391 = vmatpush3.bf16.msra.mxu0 %v2543_v63 }
 0x98a   :  { %2410 = vmatprep.subr.bf16.mxu0 %v2619_v9 }
 0xa4f   :  { %v863_v23 = vpop.f32.mrb[16].mxu0 }
 0xa50   :  { %v864_v25 = vadd.f32 %v2125_v21, %v863_v23  ;;  %v2374_v26 = vpop.f32.mrb[17].mxu0 }
 0xa51   :  { %v866_v28 = vpop.f32.mrb[18].mxu0 }
 0xa52   :  { %v867_v29 = vadd.f32 %v2125_v21, %v866_v28  ;;  %v2375_v31 = vpop.f32.mrb[19].mxu0  ;;  %v870_v24 = vadd.f32 %v864_v25, %v2832_v11 }
 0xa54   :  { %v874_v18 = vsel %vm218_vm8, %v870_v24, 0.0  ;;  %v871_v32 = vadd.f32 %v867_v29, %v2834_v12  ;;  %v2538_v12 = vld [vmem:[%s3233_s14] sm:$0xff]  }
 0xa55   :  { %875 = vadd.xlane.f32.xlu1 %v874_v18  ;;  %2377 = vmatpush3.bf16.msra.mxu1 %v2538_v12 }
 0xa56   :  { %v877_v33 = vsel %vm218_vm8, %v871_v32, 0.0  ;;  %2378 = vmatprep.subr.bf16.mxu1 %v2619_v9 }
 0xa57   :  { %878 = vadd.xlane.f32.xlu0 %v877_v33  ;;  %v2135_v33 = vld [vmem:[%s3238_s17] ss:$0 sm:$0xff] }
 0xa59   :  { %2379 = vmatpush3.bf16.msra.mxu1 %v2539_v43 }
 0xa5a   :  { %2396 = vmatprep.subr.bf16.mxu1 %v2619_v9 }
 0xae2   :  { %v876_v34 = vpop.xlane.xlu1 %875 }
 0xae3   :  { %v880_v35 = vmul.f32 0.03125, %v876_v34 }
 0xae4   :  { %v879_v37 = vpop.xlane.xlu0 %878 }
 0xae5   :  { %v882_v38 = vsub.f32 %v870_v24, %v880_v35  ;;  %v881_v39 = vmul.f32 0.03125, %v879_v37 }
 0xae7   :  { %v883_v40 = vsub.f32 %v871_v32, %v881_v39  ;;  %v884_v41 = vmul.f32 %v882_v38, %v882_v38 }
 0xae9   :  { %v886_v27 = vsel %vm218_vm8, %v884_v41, 0.0  ;;  %v885_v42 = vmul.f32 %v883_v40, %v883_v40 }
 0xaea   :  { %887 = vadd.xlane.f32.xlu0 %v886_v27 }
 0xaeb   :  { %v889_v11 = vsel %vm218_vm8, %v885_v42, 0.0 }
 0xaec   :  { %890 = vadd.xlane.f32.xlu1 %v889_v11 }
 0xb77   :  { %v888_v45 = vpop.xlane.xlu0 %887 }
 0xb78   :  { %v892_v46 = vmul.f32 0.03125, %v888_v45 }
 0xb79   :  { %v891_v47 = vpop.xlane.xlu1 %890 }
 0xb7a   :  { %v894_v48 = vadd.f32 1e-12, %v892_v46  ;;  %v893_v49 = vmul.f32 0.03125, %v891_v47 }
 0xb7c   :  { %2576 = vrsqrt.f32 %v894_v48  ;;  %v895_v50 = vadd.f32 1e-12, %v893_v49 }
 0xb7e   :  { %2578 = vrsqrt.f32 %v895_v50 }
 0xb86   :  { %v2577_v51 = vpop.eup %2576 }
 0xb87   :  { %v898_v53 = vmul.f32 %v2577_v51, %v882_v38 }
 0xb88   :  { %v2579_v19 = vpop.eup %2578 }
 0xb89   :  { %v906_v54 = vmul.f32 %v2129_v52, %v898_v53  ;;  %v899_v55 = vmul.f32 %v2579_v19, %v883_v40  ;;  %v2544_v53 = vld [vmem:[%s3261_s4 + $0x10] sm:$0xff]   ;;  %v2545_v19 = vld [vmem:[%s3261_s4 + $0x18] sm:$0xff]  }
 0xb8b   :  { %v907_v57 = vmul.f32 %v2129_v52, %v899_v55  ;;  %v914_v58 = vadd.f32 %v2130_v56, %v906_v54 }
 0xb8d   :  { %v915_v59 = vadd.f32 %v2130_v56, %v907_v57 }
 0xb8f   :  { %v920_v60 = vpack.c.bf16 %v915_v59, %v914_v58 }
 0xb91   :  { %2381 = vmatmul.mubr.msk.bf16.vlgmr.msra.gmra.mrb[24].mxu1 %vm218_vm8, %v920_v60 }
 0xb92   :  { %2400 = vmatprep.mubr.msk.bf16.mxu1 %vm2620_vm9, %v2619_v9  ;;  %2397 = vmatpush3.bf16.msra.mxu1 %v2544_v53 }
 0xb93   :  { %2398 = vmatprep.subr.bf16.mxu1 %v2619_v9 }
 0xb96   :  { %2399 = vmatpush3.bf16.msra.mxu1 %v2545_v19 }
 0xb97   :  { %2404 = vmatprep.subr.bf16.mxu1 %v2619_v9 }
 0xc64   :  { %v977_v1 = vpop.f32.mrb[24].mxu1 }
 0xc65   :  { %v978_v2 = vadd.f32 %v2131_v0, %v977_v1  ;;  %v2382_v3 = vpop.f32.mrb[25].mxu1  ;;  %v2142_v1 = vld [vmem:[%s3240_s19] ss:$0 sm:$0xff] }
 0xc66   :  { %v980_v4 = vpop.f32.mrb[26].mxu1 }
 0xc67   :  { %v986_v5 = vmul.f32 0.044715, %v978_v2  ;;  %v981_v6 = vadd.f32 %v2131_v0, %v980_v4  ;;  %v2383_v7 = vpop.f32.mrb[27].mxu1  ;;  %v984_v28 = vmul.f32 0.5, %v978_v2 }
 0xc69   :  { %v988_v8 = vmul.f32 %v986_v5, %v978_v2  ;;  %v987_v10 = vmul.f32 0.044715, %v981_v6  ;;  %v985_v29 = vmul.f32 0.5, %v981_v6 }
 0xc6b   :  { %v990_v13 = vmul.f32 %v988_v8, %v978_v2  ;;  %v989_v14 = vmul.f32 %v987_v10, %v981_v6 }
 0xc6d   :  { %v992_v15 = vadd.f32 %v990_v13, %v978_v2  ;;  %v991_v16 = vmul.f32 %v989_v14, %v981_v6 }
 0xc6f   :  { %v994_v17 = vmul.f32 0.7978846, %v992_v15  ;;  %v993_v20 = vadd.f32 %v991_v16, %v981_v6  ;;  %v2148_v6 = vld [vmem:[%s3229_s9 + $0x1] ss:$0 sm:$0xff] }
 0xc71   :  { %2580 = vtanh.f32 %v994_v17  ;;  %v995_v21 = vmul.f32 0.7978846, %v993_v20 }
 0xc73   :  { %2582 = vtanh.f32 %v995_v21 }
 0xc7b   :  { %v2581_v23 = vpop.eup %2580 }
 0xc7c   :  { %v998_v25 = vadd.f32 1.0, %v2581_v23 }
 0xc7d   :  { %v2583_v26 = vpop.eup %2582 }
 0xc7e   :  { %v999_v31 = vadd.f32 1.0, %v2583_v26  ;;  %v1000_v24 = vmul.f32 %v998_v25, %v984_v28 }
 0xc80   :  { %v1001_v18 = vmul.f32 %v999_v31, %v985_v29 }
 0xc82   :  { %v1010_v32 = vpack.c.bf16 %v1001_v18, %v1000_v24 }
 0xc84   :  { %2393 = vmatmul.mubr.msk.bf16.vlgmr.msra.gmra.mrb[20].mxu0 %vm1042_vm12, %v1010_v32 }
 0xc85   :  { %2412 = vmatprep.mubr.msk.bf16.mxu0 %vm2620_vm9, %v2619_v9 }
 0xd57   :  { %v1080_v34 = vpop.f32.mrb[20].mxu0 }
 0xd58   :  { %v1081_v35 = vadd.f32 %v2135_v33, %v1080_v34  ;;  %v2394_v37 = vpop.f32.mrb[21].mxu0 }
 0xd59   :  { %v1083_v38 = vpop.f32.mrb[22].mxu0 }
 0xd5a   :  { %v1084_v39 = vadd.f32 %v2135_v33, %v1083_v38  ;;  %v2395_v40 = vpop.f32.mrb[23].mxu0  ;;  %v1087_v41 = vadd.f32 %v1081_v35, %v914_v58 }
 0xd5c   :  { %v1091_v27 = vsel %vm218_vm8, %v1087_v41, 0.0  ;;  %v1088_v42 = vadd.f32 %v1084_v39, %v915_v59 }
 0xd5d   :  { %1092 = vadd.xlane.f32.xlu0 %v1091_v27 }
 0xd5e   :  { %v1094_v11 = vsel %vm218_vm8, %v1088_v42, 0.0 }
 0xd5f   :  { %1095 = vadd.xlane.f32.xlu1 %v1094_v11 }
 0xdea   :  { %v1093_v12 = vpop.xlane.xlu0 %1092 }
 0xdeb   :  { %v1097_v43 = vmul.f32 0.03125, %v1093_v12 }
 0xdec   :  { %v1096_v45 = vpop.xlane.xlu1 %1095 }
 0xded   :  { %v1099_v46 = vsub.f32 %v1087_v41, %v1097_v43  ;;  %v1098_v47 = vmul.f32 0.03125, %v1096_v45 }
 0xdef   :  { %v1100_v48 = vsub.f32 %v1088_v42, %v1098_v47  ;;  %v1101_v49 = vmul.f32 %v1099_v46, %v1099_v46 }
 0xdf1   :  { %v1103_v50 = vsel %vm218_vm8, %v1101_v49, 0.0  ;;  %v1102_v51 = vmul.f32 %v1100_v48, %v1100_v48 }
 0xdf2   :  { %1104 = vadd.xlane.f32.xlu0 %v1103_v50 }
 0xdf3   :  { %v1106_v52 = vsel %vm218_vm8, %v1102_v51, 0.0 }
 0xdf4   :  { %1107 = vadd.xlane.f32.xlu1 %v1106_v52 }
 0xe7f   :  { %v1105_v54 = vpop.xlane.xlu0 %1104 }
 0xe80   :  { %v1109_v55 = vmul.f32 0.03125, %v1105_v54 }
 0xe81   :  { %v1108_v56 = vpop.xlane.xlu1 %1107 }
 0xe82   :  { %v1111_v57 = vadd.f32 1e-12, %v1109_v55  ;;  %v1110_v58 = vmul.f32 0.03125, %v1108_v56 }
 0xe84   :  { %2584 = vrsqrt.f32 %v1111_v57  ;;  %v1112_v59 = vadd.f32 1e-12, %v1110_v58 }
 0xe86   :  { %2586 = vrsqrt.f32 %v1112_v59 }
 0xe8e   :  { %v2585_v60 = vpop.eup %2584 }
 0xe8f   :  { %v1115_v22 = vmul.f32 %v2585_v60, %v1099_v46 }
 0xe90   :  { %v2587_v62 = vpop.eup %2586 }
 0xe91   :  { %v1123_v63 = vmul.f32 %v2141_v61, %v1115_v22  ;;  %v1116_v0 = vmul.f32 %v2587_v62, %v1100_v48 }
 0xe93   :  { %v1124_v2 = vmul.f32 %v2141_v61, %v1116_v0  ;;  %v3025_v3 = vadd.f32 %v2142_v1, %v1123_v63 }
 0xe95   :  { %v3027_v4 = vadd.f32 %v2142_v1, %v1124_v2 }
 0xe97   :  { %v1138_v5 = vpack.c.bf16 %v3027_v4, %v3025_v3 }
 0xe99   :  { %2401 = vmatmul.mubr.msk.bf16.vlgmr.msra.gmra.mrb[28].mxu1 %vm218_vm8, %v1138_v5 }
 0xe9a   :  { %2406 = vmatprep.mubr.msk.bf16.mxu1 %vm2620_vm9, %v2619_v9 }
 0xf6c   :  { %v1196_v7 = vpop.f32.mrb[28].mxu1 }
 0xf6d   :  { %v1197_v8 = vadd.f32 %v2148_v6, %v1196_v7  ;;  %v2402_v10 = vpop.f32.mrb[29].mxu1 }
 0xf6e   :  { %v1199_v13 = vpop.f32.mrb[30].mxu1 }
 0xf6f   :  { %v3037_v14 = vpack.c.bf16 %v1197_v8, %v1197_v8  ;;  %v1200_v15 = vadd.f32 %v2148_v6, %v1199_v13  ;;  %v2403_v16 = vpop.f32.mrb[31].mxu1 }
 0xf71   :  { %v3039_v17 = vpack.c.bf16 %v1200_v15, %v1200_v15  ;;  %1206 = vrot.lane.b32.xlu0 %v3037_v14, %s2621_s7 }
 0xf73   :  { %1255 = vrot.lane.b32.xlu1 %v3039_v17, %s2621_s7 }
 0xfe3   :  { %v1207_v20 = vpop.permute.xlu0 %1206 }
 0xfe4   :  { %v1212_v21 = vsel %vm355_vm10, %v1207_v20, 0 }
 0xfe5   :  { %2405 = vmatpush3.bf16.xpose.msra.mxu1 %v1212_v21  ;;  %v1256_v23 = vpop.permute.xlu1 %1255 }
 0xfe6   :  { %v1261_v25 = vsel %vm355_vm10, %v1256_v23, 0  ;;  %2416 = vmatprep.subr.bf16.mxu1 %v2619_v9 }
 0xfe7   :  { %2411 = vmatpush3.bf16.xpose.msra.mxu0 %v1261_v25 }
 0xfe8   :  { %2422 = vmatprep.subr.bf16.mxu0 %v2619_v9 }
 0xfec   :  { %2407 = vmatmul.mubr.msk.bf16.vlgmr.msra.gmra.mrb[32].mxu1 %vm355_vm10, %v3037_v14 }
 0xfed   :  { %2418 = vmatprep.mubr.msk.bf16.mxu1 %vm2620_vm9, %v2619_v9 }
 0xfee   :  { %2413 = vmatmul.mubr.msk.bf16.vlgmr.msra.gmra.mrb[24].mxu0 %vm355_vm10, %v3039_v17 }
 0xfef   :  { %2424 = vmatprep.mubr.msk.bf16.mxu0 %vm2620_vm9, %v2619_v9 }
0x10bf   :  { %v1248_v26 = vpop.f32.mrb[32].mxu1 }
0x10c0   :  { %v1249_v28 = vadd.f32 %v1248_v26, %v2874_v36  ;;  %v2408_v29 = vpop.f32.mrb[33].mxu1 }
0x10c1   :  { %v1251_v31 = vpop.f32.mrb[34].mxu1  ;;  %v1297_v24 = vpop.f32.mrb[24].mxu0 }
0x10c2   :  { %v1298_v18 = vadd.f32 %v1297_v24, %v2878_v44  ;;  %v2409_v32 = vpop.f32.mrb[35].mxu1  ;;  %v2414_v33 = vpop.f32.mrb[25].mxu0  ;;  %v1303_v34 = vsel %vm451_vm11, %v1249_v28, -inf }
0x10c3   :  { %v1300_v35 = vpop.f32.mrb[26].mxu0  ;;  %1304 = vmax.xlane.f32.xlu1 %v1303_v34 }
0x10c4   :  { %v2415_v37 = vpop.f32.mrb[27].mxu0  ;;  %v1306_v38 = vsel %vm451_vm11, %v1298_v18, -inf }
0x10c5   :  { %1307 = vmax.xlane.f32.xlu0 %v1306_v38 }
0x10d4   :  { %1375 = vrot.lane.b32.xlu1 %v3039_v17, %s2622_s2 }
0x10db   :  { %1327 = vrot.lane.b32.xlu0 %v3037_v14, %s2622_s2 }
0x1150   :  { %v1305_v39 = vpop.xlane.xlu1 %1304 }
0x1151   :  { %v1309_v40 = vsub.f32 %v1249_v28, %v1305_v39 }
0x1152   :  { %v1308_v41 = vpop.xlane.xlu0 %1307 }
0x1153   :  { %v1311_v27 = vmul.f32 1.442695, %v1309_v40  ;;  %v1310_v42 = vsub.f32 %v1298_v18, %v1308_v41 }
0x1154   :  { %v1376_v11 = vpop.permute.xlu1 %1375 }
0x1155   :  { %2588 = vpow2.f32 %v1311_v27  ;;  %v1313_v12 = vmul.f32 1.442695, %v1310_v42  ;;  %v1381_v43 = vsel %vm134_vm2, %v1376_v11, 0 }
0x1156   :  { %v1328_v45 = vpop.permute.xlu0 %1327  ;;  %2423 = vmatpush3.bf16.msra.mxu0 %v1381_v43 }
0x1157   :  { %2590 = vpow2.f32 %v1313_v12  ;;  %v1333_v46 = vsel %vm134_vm2, %v1328_v45, 0  ;;  %2434 = vmatprep.subr.bf16.mxu0 %v2619_v9 }
0x1158   :  { %2417 = vmatpush3.bf16.msra.mxu1 %v1333_v46 }
0x1159   :  { %2428 = vmatprep.subr.bf16.mxu1 %v2619_v9 }
0x115f   :  { %v2589_v47 = vpop.eup %2588 }
0x1160   :  { %v1315_v48 = vsel %vm451_vm11, %v2589_v47, 0.0 }
0x1161   :  { %v2591_v49 = vpop.eup %2590  ;;  %1316 = vadd.xlane.f32.xlu0 %v1315_v48  ;;  %v2547_v48 = vld [vmem:[%s3231_s10 + $0x18] sm:$0xff]  }
0x1162   :  { %v1318_v50 = vsel %vm451_vm11, %v2591_v49, 0.0 }
0x1163   :  { %1319 = vadd.xlane.f32.xlu1 %v1318_v50 }
0x1174   :  { %1425 = vrot.lane.b32.xlu1 %v3037_v14, %s2623_s30 }
0x1177   :  { %1475 = vrot.lane.b32.xlu0 %v3039_v17, %s2623_s30 }
0x1178   :  { %1423 = vrot.lane.b32.xlu1 %v3037_v14, %s2624_s29 }
0x117b   :  { %1473 = vrot.lane.b32.xlu0 %v3039_v17, %s2624_s29 }
0x11ee   :  { %v1317_v51 = vpop.xlane.xlu0 %1316 }
0x11ef   :  { %2592 = vrcp.f32 %v1317_v51 }
0x11f0   :  { %v1320_v52 = vpop.xlane.xlu1 %1319 }
0x11f1   :  { %2594 = vrcp.f32 %v1320_v52 }
0x11f2   :  { %v1476_v58 = vpop.permute.xlu0 %1475 }
0x11f3   :  { %v1481_v61 = vsel %vm355_vm10, %v1476_v58, 0 }
0x11f4   :  { %v1426_v55 = vpop.permute.xlu1 %1425 }
0x11f5   :  { %v1431_v59 = vsel %vm355_vm10, %v1426_v55, 0 }
0x11f6   :  { %v1474_v62 = vpop.permute.xlu0 %1473 }
0x11f8   :  { %v1424_v22 = vpop.permute.xlu1 %1423 }
0x11f9   :  { %v2593_v53 = vpop.eup %2592 }
0x11fa   :  { %v1323_v19 = vmul.f32 %v2593_v53, %v2589_v47  ;;  %v2546_v47 = vld [vmem:[%s3231_s10 + $0x10] sm:$0xff]  }
0x11fb   :  { %v2595_v54 = vpop.eup %2594 }
0x11fc   :  { %v1324_v56 = vmul.f32 %v2595_v54, %v2591_v49  ;;  %v1325_v57 = vpack.c.bf16 %v1323_v19, %v1323_v19 }
0x11fe   :  { %2419 = vmatmul.mubr.msk.bf16.vlgmr.msra.gmra.mrb[36].mxu1 %vm451_vm11, %v1325_v57  ;;  %v1326_v60 = vpack.c.bf16 %v1324_v56, %v1324_v56 }
0x11ff   :  { %2429 = vmatpush3.bf16.xpose.msra.mxu1 %v1431_v59  ;;  %2430 = vmatprep.mubr.msk.bf16.mxu1 %vm2620_vm9, %v2619_v9 }
0x1200   :  { %2425 = vmatmul.mubr.msk.bf16.vlgmr.msra.gmra.mrb[28].mxu0 %vm451_vm11, %v1326_v60  ;;  %2440 = vmatprep.subr.bf16.mxu1 %v2619_v9 }
0x1201   :  { %2435 = vmatpush3.bf16.xpose.msra.mxu0 %v1481_v61  ;;  %2436 = vmatprep.mubr.msk.bf16.mxu0 %vm2620_vm9, %v2619_v9 }
0x1202   :  { %2446 = vmatprep.subr.bf16.mxu0 %v2619_v9 }
0x1206   :  { %2431 = vmatmul.mubr.msk.bf16.vlgmr.msra.gmra.mrb[40].mxu1 %vm355_vm10, %v1424_v22 }
0x1207   :  { %2442 = vmatprep.mubr.msk.bf16.mxu1 %vm2620_vm9, %v2619_v9 }
0x1208   :  { %2437 = vmatmul.mubr.msk.bf16.vlgmr.msra.gmra.mrb[32].mxu0 %vm355_vm10, %v1474_v62  ;;  %v2165_v62 = vld [vmem:[%s3232_s11 + $0x1] ss:$0 sm:$0xff] }
0x1209   :  { %2448 = vmatprep.mubr.msk.bf16.mxu0 %vm2620_vm9, %v2619_v9 }
0x12d1   :  { %v3095_v63 = vpop.f32.mrb[36].mxu1 }
0x12d2   :  { %v2420_v0 = vpop.f32.mrb[37].mxu1 }
0x12d3   :  { %v1372_v1 = vpop.f32.mrb[38].mxu1  ;;  %v3097_v2 = vpop.f32.mrb[28].mxu0 }
0x12d4   :  { %v2421_v5 = vpop.f32.mrb[39].mxu1  ;;  %v2426_v6 = vpop.f32.mrb[29].mxu0 }
0x12d5   :  { %v1420_v7 = vpop.f32.mrb[30].mxu0 }
0x12d6   :  { %v2427_v8 = vpop.f32.mrb[31].mxu0 }
0x12d9   :  { %v1467_v10 = vpop.f32.mrb[40].mxu1 }
0x12da   :  { %v1468_v13 = vadd.f32 %v1467_v10, %v2874_v36  ;;  %v2432_v15 = vpop.f32.mrb[41].mxu1 }
0x12db   :  { %v1470_v16 = vpop.f32.mrb[42].mxu1  ;;  %v1517_v20 = vpop.f32.mrb[32].mxu0 }
0x12dc   :  { %v1518_v21 = vadd.f32 %v1517_v20, %v2878_v44  ;;  %v2433_v23 = vpop.f32.mrb[43].mxu1  ;;  %v2438_v25 = vpop.f32.mrb[33].mxu0  ;;  %v1523_v26 = vsel %vm451_vm11, %v1468_v13, -inf }
0x12dd   :  { %v1520_v28 = vpop.f32.mrb[34].mxu0  ;;  %1524 = vmax.xlane.f32.xlu1 %v1523_v26 }
0x12de   :  { %v2439_v29 = vpop.f32.mrb[35].mxu0  ;;  %v1526_v31 = vsel %vm451_vm11, %v1518_v21, -inf }
0x12df   :  { %1527 = vmax.xlane.f32.xlu0 %v1526_v31  ;;  %v2549_v31 = vld [vmem:[%s3233_s14 + $0x18] sm:$0xff]  }
0x136a   :  { %v1525_v24 = vpop.xlane.xlu1 %1524 }
0x136b   :  { %v1529_v18 = vsub.f32 %v1468_v13, %v1525_v24 }
0x136c   :  { %v1528_v32 = vpop.xlane.xlu0 %1527 }
0x136d   :  { %v1531_v33 = vmul.f32 1.442695, %v1529_v18  ;;  %v1530_v36 = vsub.f32 %v1518_v21, %v1528_v32 }
0x136f   :  { %2596 = vpow2.f32 %v1531_v33  ;;  %v1533_v34 = vmul.f32 1.442695, %v1530_v36 }
0x1371   :  { %2598 = vpow2.f32 %v1533_v34 }
0x1379   :  { %v2597_v35 = vpop.eup %2596 }
0x137a   :  { %v1535_v44 = vsel %vm451_vm11, %v2597_v35, 0.0 }
0x137b   :  { %v2599_v37 = vpop.eup %2598  ;;  %1536 = vadd.xlane.f32.xlu0 %v1535_v44 }
0x137c   :  { %v1538_v38 = vsel %vm451_vm11, %v2599_v37, 0.0 }
0x137d   :  { %1539 = vadd.xlane.f32.xlu1 %v1538_v38 }
0x138e   :  { %1595 = vrot.lane.b32.xlu1 %v3039_v17, %s2625_s23 }
0x1391   :  { %1547 = vrot.lane.b32.xlu0 %v3037_v14, %s2625_s23 }
0x1408   :  { %v1537_v39 = vpop.xlane.xlu0 %1536 }
0x1409   :  { %2600 = vrcp.f32 %v1537_v39 }
0x140a   :  { %v1540_v40 = vpop.xlane.xlu1 %1539 }
0x140b   :  { %2602 = vrcp.f32 %v1540_v40 }
0x140c   :  { %v1548_v41 = vpop.permute.xlu0 %1547 }
0x140d   :  { %v1553_v27 = vsel %vm134_vm2, %v1548_v41, 0  ;;  %v2172_v41 = vld [vmem:[%s3235_s13 + $0x1] ss:$0 sm:$0xff] }
0x140e   :  { %2441 = vmatpush3.bf16.msra.mxu1 %v1553_v27  ;;  %v1596_v42 = vpop.permute.xlu1 %1595 }
0x140f   :  { %v1601_v11 = vsel %vm134_vm2, %v1596_v42, 0  ;;  %2452 = vmatprep.subr.bf16.mxu1 %v2619_v9 }
0x1410   :  { %2447 = vmatpush3.bf16.msra.mxu0 %v1601_v11 }
0x1411   :  { %2460 = vmatprep.subr.bf16.mxu0 %v2619_v9 }
0x1413   :  { %v2601_v17 = vpop.eup %2600 }
0x1414   :  { %v1543_v12 = vmul.f32 %v2601_v17, %v2597_v35 }
0x1415   :  { %v2603_v43 = vpop.eup %2602 }
0x1416   :  { %v1544_v14 = vmul.f32 %v2603_v43, %v2599_v37  ;;  %v1545_v45 = vpack.c.bf16 %v1543_v12, %v1543_v12  ;;  %v2171_v37 = vld [vmem:[%s3234_s12 + $0x1] ss:$0 sm:$0xff]  ;;  %v2551_v43 = vld [vmem:[%s3236_s16 + $0x28] sm:$0xff]  }
0x1417   :  { %v2550_v12 = vld [vmem:[%s3236_s16 + $0x20] sm:$0xff]  }
0x1418   :  { %2443 = vmatmul.mubr.msk.bf16.vlgmr.msra.gmra.mrb[44].mxu1 %vm451_vm11, %v1545_v45  ;;  %v1546_v46 = vpack.c.bf16 %v1544_v14, %v1544_v14  ;;  %v2552_v14 = vld [vmem:[%s3236_s16 + $0x30] sm:$0xff]   ;;  %v2553_v45 = vld [vmem:[%s3236_s16 + $0x38] sm:$0xff]  }
0x1419   :  { %2456 = vmatprep.mubr.msk.bf16.mxu1 %vm2620_vm9, %v2619_v9  ;;  %2453 = vmatpush3.bf16.msra.mxu1 %v2546_v47 }
0x141a   :  { %2449 = vmatmul.mubr.msk.bf16.vlgmr.msra.gmra.mrb[36].mxu0 %vm451_vm11, %v1546_v46  ;;  %2454 = vmatprep.subr.bf16.mxu1 %v2619_v9  ;;  %v2178_v46 = vld [vmem:[%s3237_s15 + $0x1] ss:$0 sm:$0xff] }
0x141b   :  { %2464 = vmatprep.mubr.msk.bf16.mxu0 %vm2620_vm9, %v2619_v9 }
0x141d   :  { %2455 = vmatpush3.bf16.msra.mxu1 %v2547_v48 }
0x141e   :  { %2468 = vmatprep.subr.bf16.mxu1 %v2619_v9 }
0x14eb   :  { %v1589_v49 = vpop.f32.mrb[44].mxu1 }
0x14ec   :  { %v2444_v50 = vpop.f32.mrb[45].mxu1 }
0x14ed   :  { %v1592_v51 = vpop.f32.mrb[46].mxu1  ;;  %v1637_v52 = vpop.f32.mrb[36].mxu0 }
0x14ee   :  { %v2529_v53 = vpack.i.bf16 %v1637_v52, %v1589_v49  ;;  %v2445_v19 = vpop.f32.mrb[47].mxu1  ;;  %v2450_v54 = vpop.f32.mrb[37].mxu0 }
0x14ef   :  { %v1640_v55 = vpop.f32.mrb[38].mxu0 }
0x14f0   :  { %v2451_v56 = vpop.f32.mrb[39].mxu0  ;;  %2530 = vrot.lane.b32.xlu1 %v2529_v53, %s2626_s6 }
0x1562   :  { %v2531_v57 = vpop.permute.xlu1 %2530 }
0x1563   :  { %v2533_v58 = vunpack.i.h.bf16 %v2531_v57  ;;  %v2532_v59 = vunpack.i.l.bf16 %v2531_v57 }
0x1565   :  { %v1652_v60 = vsel %vm355_vm10, %v3097_v2, %v2533_v58  ;;  %v1651_v61 = vsel %vm355_vm10, %v3095_v63, %v2532_v59 }
0x1566   :  { %v1658_v22 = vpack.c.bf16 %v1652_v60, %v1651_v61 }
0x1568   :  { %2457 = vmatmul.mubr.msk.bf16.vlgmr.msra.gmra.mrb[48].mxu1 %vm218_vm8, %v1658_v22 }
0x1569   :  { %2476 = vmatprep.mubr.msk.bf16.mxu1 %vm2620_vm9, %v2619_v9  ;;  %2469 = vmatpush3.bf16.msra.mxu1 %v2550_v12 }
0x156a   :  { %2470 = vmatprep.subr.bf16.mxu1 %v2619_v9 }
0x156d   :  { %2471 = vmatpush3.bf16.msra.mxu1 %v2551_v43 }
0x156e   :  { %2472 = vmatprep.subr.bf16.mxu1 %v2619_v9 }
0x1571   :  { %2473 = vmatpush3.bf16.msra.mxu1 %v2552_v14 }
0x1572   :  { %2474 = vmatprep.subr.bf16.mxu1 %v2619_v9 }
0x1575   :  { %2475 = vmatpush3.bf16.msra.mxu1 %v2553_v45 }
0x163b   :  { %v1716_v0 = vpop.f32.mrb[48].mxu1 }
0x163c   :  { %v1717_v1 = vadd.f32 %v2165_v62, %v1716_v0  ;;  %v2458_v5 = vpop.f32.mrb[49].mxu1 }
0x163d   :  { %v1719_v6 = vpop.f32.mrb[50].mxu1 }
0x163e   :  { %v1720_v7 = vadd.f32 %v2165_v62, %v1719_v6  ;;  %v2459_v8 = vpop.f32.mrb[51].mxu1  ;;  %v1723_v2 = vadd.f32 %v1717_v1, %v3025_v3 }
0x1640   :  { %v1729_v63 = vsel %vm218_vm8, %v1723_v2, 0.0  ;;  %v1724_v10 = vadd.f32 %v1720_v7, %v3027_v4  ;;  %v2548_v4 = vld [vmem:[%s3233_s14 + $0x10] sm:$0xff]  }
0x1641   :  { %1730 = vadd.xlane.f32.xlu0 %v1729_v63  ;;  %2461 = vmatpush3.bf16.msra.mxu0 %v2548_v4  ;;  %v2191_v63 = vld [vmem:[%s3238_s17 + $0x1] ss:$0 sm:$0xff] }
0x1642   :  { %v1732_v13 = vsel %vm218_vm8, %v1724_v10, 0.0  ;;  %2462 = vmatprep.subr.bf16.mxu0 %v2619_v9 }
0x1643   :  { %1733 = vadd.xlane.f32.xlu1 %v1732_v13 }
0x1645   :  { %2463 = vmatpush3.bf16.msra.mxu0 %v2549_v31 }
0x1646   :  { %2480 = vmatprep.subr.bf16.mxu0 %v2619_v9 }
0x16ce   :  { %v1731_v15 = vpop.xlane.xlu0 %1730 }
0x16cf   :  { %v1735_v16 = vmul.f32 0.03125, %v1731_v15 }
0x16d0   :  { %v1734_v20 = vpop.xlane.xlu1 %1733 }
0x16d1   :  { %v1737_v21 = vsub.f32 %v1723_v2, %v1735_v16  ;;  %v1736_v23 = vmul.f32 0.03125, %v1734_v20 }
0x16d3   :  { %v1738_v25 = vsub.f32 %v1724_v10, %v1736_v23  ;;  %v1739_v26 = vmul.f32 %v1737_v21, %v1737_v21 }
0x16d5   :  { %v1741_v28 = vsel %vm218_vm8, %v1739_v26, 0.0  ;;  %v1740_v29 = vmul.f32 %v1738_v25, %v1738_v25 }
0x16d6   :  { %1742 = vadd.xlane.f32.xlu0 %v1741_v28 }
0x16d7   :  { %v1744_v3 = vsel %vm218_vm8, %v1740_v29, 0.0 }
0x16da   :  { %1745 = vadd.xlane.f32.xlu0 %v1744_v3 }
0x1763   :  { %v1743_v24 = vpop.xlane.xlu0 %1742 }
0x1764   :  { %v1747_v18 = vmul.f32 0.03125, %v1743_v24 }
0x1766   :  { %v1749_v32 = vadd.f32 1e-12, %v1747_v18 }
0x1767   :  { %v1746_v33 = vpop.xlane.xlu0 %1745 }
0x1768   :  { %2604 = vrsqrt.f32 %v1749_v32  ;;  %v1748_v36 = vmul.f32 0.03125, %v1746_v33 }
0x176a   :  { %v1750_v34 = vadd.f32 1e-12, %v1748_v36 }
0x176c   :  { %2606 = vrsqrt.f32 %v1750_v34 }
0x1772   :  { %v2605_v35 = vpop.eup %2604 }
0x1773   :  { %v1753_v44 = vmul.f32 %v2605_v35, %v1737_v21  ;;  %v2554_v35 = vld [vmem:[%s3241_s20] sm:$0xff]  }
0x1775   :  { %v1761_v39 = vmul.f32 %v2171_v37, %v1753_v44  ;;  %v2555_v44 = vld [vmem:[%s3241_s20 + $0x8] sm:$0xff]  }
0x1776   :  { %v2607_v38 = vpop.eup %2606 }
0x1777   :  { %v1754_v40 = vmul.f32 %v2607_v38, %v1738_v25  ;;  %v1769_v42 = vadd.f32 %v2172_v41, %v1761_v39 }
0x1779   :  { %v1762_v27 = vmul.f32 %v2171_v37, %v1754_v40 }
0x177b   :  { %v1770_v11 = vadd.f32 %v2172_v41, %v1762_v27 }
0x177d   :  { %v1776_v17 = vpack.c.bf16 %v1770_v11, %v1769_v42 }
0x177f   :  { %2465 = vmatmul.mubr.msk.bf16.vlgmr.msra.gmra.mrb[40].mxu0 %vm218_vm8, %v1776_v17 }
0x1780   :  { %2484 = vmatprep.mubr.msk.bf16.mxu0 %vm2620_vm9, %v2619_v9  ;;  %2481 = vmatpush3.bf16.msra.mxu0 %v2554_v35 }
0x1781   :  { %2482 = vmatprep.subr.bf16.mxu0 %v2619_v9  ;;  %v2200_v9 = vld [vmem:[%s3240_s19 + $0x1] ss:$0 sm:$0xff] }
0x1784   :  { %2483 = vmatpush3.bf16.msra.mxu0 %v2555_v44 }
0x1852   :  { %v1834_v47 = vpop.f32.mrb[40].mxu0 }
0x1853   :  { %v1835_v48 = vadd.f32 %v2178_v46, %v1834_v47  ;;  %v2466_v49 = vpop.f32.mrb[41].mxu0 }
0x1854   :  { %v1837_v50 = vpop.f32.mrb[42].mxu0 }
0x1855   :  { %v1843_v51 = vmul.f32 0.044715, %v1835_v48  ;;  %v1838_v52 = vadd.f32 %v2178_v46, %v1837_v50  ;;  %v2467_v53 = vpop.f32.mrb[43].mxu0  ;;  %v1841_v1 = vmul.f32 0.5, %v1835_v48 }
0x1857   :  { %v1845_v19 = vmul.f32 %v1843_v51, %v1835_v48  ;;  %v1844_v54 = vmul.f32 0.044715, %v1838_v52  ;;  %v1842_v5 = vmul.f32 0.5, %v1838_v52 }
0x1859   :  { %v1847_v55 = vmul.f32 %v1845_v19, %v1835_v48  ;;  %v1846_v56 = vmul.f32 %v1844_v54, %v1838_v52  ;;  %v2201_v54 = vld [vmem:[%s3243_s21] ss:$0 sm:$0xff] }
0x185b   :  { %v1849_v57 = vadd.f32 %v1847_v55, %v1835_v48  ;;  %v1848_v58 = vmul.f32 %v1846_v56, %v1838_v52 }
0x185d   :  { %v1851_v59 = vmul.f32 0.7978846, %v1849_v57  ;;  %v1850_v60 = vadd.f32 %v1848_v58, %v1838_v52  ;;  %v2627_v58 = vmov 1966171168  }
0x185f   :  { %2608 = vtanh.f32 %v1851_v59  ;;  %v1852_v61 = vmul.f32 0.7978846, %v1850_v60  ;;  %v2075_v59 = vunpack.c.l.s4 %v2627_v58 }
0x1861   :  { %2610 = vtanh.f32 %v1852_v61 }
0x1869   :  { %v2609_v22 = vpop.eup %2608 }
0x186a   :  { %v1855_v62 = vadd.f32 1.0, %v2609_v22  ;;  %v2076_v22 = vunpack.c.0.s8 %v2075_v59 }
0x186b   :  { %v2611_v0 = vpop.eup %2610 }
0x186c   :  { %v1856_v6 = vadd.f32 1.0, %v2611_v0  ;;  %v1857_v7 = vmul.f32 %v1855_v62, %v1841_v1  ;;  %v2079_v62 = vsub.s32 %v2076_v22, %v2868_v30 }
0x186e   :  { %v1858_v8 = vmul.f32 %v1856_v6, %v1842_v5 }
0x1870   :  { %v1868_v2 = vpack.c.bf16 %v1858_v8, %v1857_v7 }
0x1872   :  { %2477 = vmatmul.mubr.msk.bf16.vlgmr.msra.gmra.mrb[52].mxu1 %vm1042_vm12, %v1868_v2 }
0x1945   :  { %v1938_v10 = vpop.f32.mrb[52].mxu1 }
0x1946   :  { %v1939_v13 = vadd.f32 %v2191_v63, %v1938_v10  ;;  %v2478_v15 = vpop.f32.mrb[53].mxu1 }
0x1947   :  { %v1941_v16 = vpop.f32.mrb[54].mxu1 }
0x1948   :  { %v1942_v20 = vadd.f32 %v2191_v63, %v1941_v16  ;;  %v2479_v21 = vpop.f32.mrb[55].mxu1  ;;  %v1945_v23 = vadd.f32 %v1939_v13, %v1769_v42 }
0x194a   :  { %v1951_v25 = vsel %vm218_vm8, %v1945_v23, 0.0  ;;  %v1946_v26 = vadd.f32 %v1942_v20, %v1770_v11  ;;  %v2199_v11 = vld [vmem:[%s3239_s18 + $0x1] ss:$0 sm:$0xff] }
0x194b   :  { %1952 = vadd.xlane.f32.xlu0 %v1951_v25 }
0x194c   :  { %v1954_v28 = vsel %vm218_vm8, %v1946_v26, 0.0 }
0x194d   :  { %1955 = vadd.xlane.f32.xlu1 %v1954_v28 }
0x19d8   :  { %v1953_v29 = vpop.xlane.xlu0 %1952 }
0x19d9   :  { %v1957_v3 = vmul.f32 0.03125, %v1953_v29 }
0x19da   :  { %v1956_v4 = vpop.xlane.xlu1 %1955 }
0x19db   :  { %v1959_v31 = vsub.f32 %v1945_v23, %v1957_v3  ;;  %v1958_v24 = vmul.f32 0.03125, %v1956_v4 }
0x19dd   :  { %v1960_v18 = vsub.f32 %v1946_v26, %v1958_v24  ;;  %v1961_v32 = vmul.f32 %v1959_v31, %v1959_v31 }
0x19df   :  { %v1963_v33 = vsel %vm218_vm8, %v1961_v32, 0.0  ;;  %v1962_v36 = vmul.f32 %v1960_v18, %v1960_v18 }
0x19e0   :  { %1964 = vadd.xlane.f32.xlu0 %v1963_v33 }
0x19e1   :  { %v1966_v34 = vsel %vm218_vm8, %v1962_v36, 0.0 }
0x19e2   :  { %1967 = vadd.xlane.f32.xlu1 %v1966_v34 }
0x1a6d   :  { %v1965_v37 = vpop.xlane.xlu0 %1964 }
0x1a6e   :  { %v1969_v38 = vmul.f32 0.03125, %v1965_v37 }
0x1a6f   :  { %v1968_v39 = vpop.xlane.xlu1 %1967 }
0x1a70   :  { %v1971_v40 = vadd.f32 1e-12, %v1969_v38  ;;  %v1970_v41 = vmul.f32 0.03125, %v1968_v39 }
0x1a72   :  { %2612 = vrsqrt.f32 %v1971_v40  ;;  %v1972_v27 = vadd.f32 1e-12, %v1970_v41 }
0x1a74   :  { %2614 = vrsqrt.f32 %v1972_v27 }
0x1a7c   :  { %v2613_v42 = vpop.eup %2612 }
0x1a7d   :  { %v1975_v17 = vmul.f32 %v2613_v42, %v1959_v31 }
0x1a7e   :  { %v2615_v12 = vpop.eup %2614 }
0x1a7f   :  { %v1983_v43 = vmul.f32 %v2199_v11, %v1975_v17  ;;  %v1976_v14 = vmul.f32 %v2615_v12, %v1960_v18 }
0x1a81   :  { %v1991_v45 = vadd.f32 %v2200_v9, %v1983_v43  ;;  %v1984_v46 = vmul.f32 %v2199_v11, %v1976_v14 }
0x1a83   :  { %2071 = vst.msk [vmem:[%s3242_s22] sm:$0x1] %vm2070_vm13, %v1991_v45  ;;  %v1992_v47 = vadd.f32 %v2200_v9, %v1984_v46  ;;  %v1997_v48 = vpack.c.bf16 %v1991_v45, %v1991_v45 }
0x1a85   :  { %2072 = vst.msk [vmem:[%s3242_s22 + $0x2] sm:$0x1] %vm2070_vm13, %v1992_v47  ;;  %v1998_v49 = vpack.c.bf16 %v1992_v47, %v1992_v47  ;;  %v2008_v51 = vunpack.c.l.b16 %v1997_v48 }
0x1a87   :  { %v2009_v50 = vunpack.c.l.b16 %v1998_v49 }
0x1a89   :  { %v2010_v52 = vrot.slane %v2009_v50, 7 }
0x1a8b   :  { %v2012_v53 = vsel %vm2011_vm14, %v2010_v52, %v2008_v51 }
0x1a8c   :  { %v2013_v19 = vpack.c.b16 %v2012_v53, %v2012_v53 }
0x1a8e   :  { %2485 = vmatmul.mubr.msk.bf16.vlgmr.msra.gmra.mrb[44].mxu0 %vm218_vm8, %v2013_v19 }
0x1b61   :  { %v2063_v55 = vpop.f32.mrb[44].mxu0 }
0x1b62   :  { %v2064_v56 = vadd.f32 %v2201_v54, %v2063_v55  ;;  %v2486_v57 = vpop.f32.mrb[45].mxu0 }
0x1b63   :  { %v2066_v60 = vpop.f32.mrb[46].mxu0 }
0x1b64   :  { %2616 = vtanh.f32 %v2064_v56  ;;  %v2487_v61 = vpop.f32.mrb[47].mxu0 }
0x1b6e   :  { %v2617_v0 = vpop.eup %2616 }
0x1b6f   :  { %v2080_v1 = vrot.slane %v2617_v0, %v2079_v62 }
0x1b71   :  { %v2081_v5 = vcombine.high %v2080_v1, %v2080_v1  ;;  %v2088_v6 = vrot.slane %v2080_v1, %v2079_v62 }
0x1b73   :  { %v2095_v7 = vrot.slane %v2081_v5, %v2079_v62  ;;  %2098 = vst.msk [vmem:[%s3242_s22 + $0x1] sm:$0x1] %vm2070_vm13, %v2088_v6 }
0x1b75   :  { %2099 = vst.msk [vmem:[%s3242_s22 + $0x3] sm:$0x1] %vm2070_vm13, %v2095_v7 }

</bundles_post_ra>
